<compile_context>
chip_gen: v7x
topology: tpu7x:2x2x1
jax: 0.10.0
libtpu: 0.0.40
codegen_flags: <defaults>
</compile_context>

<pallas_src>
import functools

import jax
import jax.numpy as jnp
from jax.experimental import pallas as pl
from jax.experimental.pallas import tpu as pltpu


def _round_up(x, m):
    return ((x + m - 1) // m) * m


# ---------------------------------------------------------------------------
# Pallas kernels: one SAGEConv layer = tiled (A @ X) into a resident f32
# accumulator + fused normalize / project / bias / ReLU in the finalize step.
# ---------------------------------------------------------------------------
def _sage_post_kernel(a_ref, xk_ref, xi_ref, dinv_ref, wl_ref, wr_ref, b_ref,
                      o_ref, acc_ref, *, apply_relu):
    """Aggregate raw features; apply W_l in the finalize step."""
    k = pl.program_id(1)

    @pl.when(k == 0)
    def _():
        acc_ref[...] = jnp.zeros_like(acc_ref)

    acc_ref[...] += jnp.dot(a_ref[...], xk_ref[...],
                            preferred_element_type=jnp.float32)

    @pl.when(k == pl.num_programs(1) - 1)
    def _():
        agg = (acc_ref[...] * dinv_ref[...]).astype(jnp.bfloat16)
        out = (jnp.dot(agg, wl_ref[...], preferred_element_type=jnp.float32)
               + jnp.dot(xi_ref[...], wr_ref[...],
                         preferred_element_type=jnp.float32)
               + b_ref[...])
        if apply_relu:
            out = jnp.maximum(out, 0.0)
        o_ref[...] = out.astype(o_ref.dtype)


def _sage_pre_kernel(a_ref, xk_ref, xi_ref, dinv_ref, wr_ref, b_ref,
                     o_ref, acc_ref, *, apply_relu):
    """Aggregate pre-projected (X @ W_l) features; finalize only normalizes,
    adds the root term and the bias."""
    k = pl.program_id(1)

    @pl.when(k == 0)
    def _():
        acc_ref[...] = jnp.zeros_like(acc_ref)

    acc_ref[...] += jnp.dot(a_ref[...], xk_ref[...],
                            preferred_element_type=jnp.float32)

    @pl.when(k == pl.num_programs(1) - 1)
    def _():
        out = (acc_ref[...] * dinv_ref[...]
               + jnp.dot(xi_ref[...], wr_ref[...],
                         preferred_element_type=jnp.float32)
               + b_ref[...])
        if apply_relu:
            out = jnp.maximum(out, 0.0)
        o_ref[...] = out.astype(o_ref.dtype)


def sage_conv_padded(a_p, dinv_p, x_agg, x_root, w_l, w_r, b, *,
                     relu, out_dtype, tm, tk):
    """One SAGEConv layer on pre-padded inputs.

    a_p    : (Np, Np)   bf16 raw edge-count adjacency (row i = in-edges of i)
    dinv_p : (Np, 1)    f32  1 / max(in_degree, 1)
    x_agg  : (Np, Ca_p) bf16 contraction operand (raw X, or X @ W_l if w_l is
                             None -- the "pre-projected" narrow-aggregation path)
    x_root : (Np, Ci_p) bf16 root features
    w_l    : (Ci, Co) f32 or None (pre-projected); w_r : (Ci, Co) f32; b : (1, Co)
    """
    np_ = a_p.shape[0]
    c_agg_p = x_agg.shape[1]
    c_in_p = x_root.shape[1]
    c_in, c_out = w_r.shape
    c_out_p = _round_up(c_out, 128)

    wr_p = jnp.zeros((c_in_p, c_out_p), jnp.bfloat16)
    wr_p = wr_p.at[:c_in, :c_out].set(w_r.astype(jnp.bfloat16))
    b_p = jnp.zeros((1, c_out_p), jnp.float32).at[:, :c_out].set(b)

    pre_projected = w_l is None
    if pre_projected:
        assert c_agg_p == c_out_p, (c_agg_p, c_out_p)

    grid = (np_ // tm, np_ // tk)

    # NOTE: if xprof shows DMA-wait gaps at row-tile boundaries, add
    # pipeline_mode=pl.Buffered(3) to the A BlockSpec below.
    in_specs = [
        pl.BlockSpec((tm, tk), lambda i, k: (i, k)),         # A tile
        pl.BlockSpec((tk, c_agg_p), lambda i, k: (k, 0)),    # X (aggregation)
        pl.BlockSpec((tm, c_in_p), lambda i, k: (i, 0)),     # X (root)
        pl.BlockSpec((tm, 1), lambda i, k: (i, 0)),          # 1/deg
    ]
    operands = [a_p, x_agg, x_root, dinv_p]

    if pre_projected:
        kernel = functools.partial(_sage_pre_kernel, apply_relu=relu)
    else:
        wl_p = jnp.zeros((c_in_p, c_out_p), jnp.bfloat16)
        wl_p = wl_p.at[:c_in, :c_out].set(w_l.astype(jnp.bfloat16))
        in_specs.append(pl.BlockSpec((c_in_p, c_out_p), lambda i, k: (0, 0)))
        operands.append(wl_p)
        kernel = functools.partial(_sage_post_kernel, apply_relu=relu)

    in_specs += [
        pl.BlockSpec((c_in_p, c_out_p), lambda i, k: (0, 0)),  # W_r
        pl.BlockSpec((1, c_out_p), lambda i, k: (0, 0)),       # bias
    ]
    operands += [wr_p, b_p]

    return pl.pallas_call(
        kernel,
        out_shape=jax.ShapeDtypeStruct((np_, c_out_p), out_dtype),
        grid_spec=pltpu.PrefetchScalarGridSpec(
            num_scalar_prefetch=0,
            grid=grid,
            in_specs=in_specs,
            out_specs=pl.BlockSpec((tm, c_out_p), lambda i, k: (i, 0)),
            scratch_shapes=[pltpu.VMEM((tm, c_agg_p), jnp.float32)],
        ),
        compiler_params=pltpu.CompilerParams(
            dimension_semantics=("parallel", "arbitrary"),
            vmem_limit_bytes=32 * 1024 * 1024,
        ),
    )(*operands)


# ---------------------------------------------------------------------------
# Glue: padded adjacency construction + parameter init + forward pass
# ---------------------------------------------------------------------------
def build_padded_graph(edge_index, num_nodes, num_nodes_padded):
    """Padded bf16 edge-count adjacency + f32 inverse in-degree.

    Built directly into the padded bf16 buffer (no N x N f32 intermediate or
    cast/pad copy); in-degree via segment_sum over the destination index.
    Edge counts stored in bf16 are exact up to 256 parallel edges per pair.
    """
    src = edge_index[0]
    dst = edge_index[1]
    ones = jnp.ones(src.shape, jnp.float32)
    deg = jax.ops.segment_sum(ones, dst, num_segments=num_nodes)
    dinv = 1.0 / jnp.maximum(deg, 1.0)
    a_p = jnp.zeros((num_nodes_padded, num_nodes_padded), jnp.bfloat16)
    a_p = a_p.at[dst, src].add(ones.astype(jnp.bfloat16))
    dinv_p = jnp.zeros((num_nodes_padded, 1), jnp.float32)
    dinv_p = dinv_p.at[:num_nodes, 0].set(dinv)
    return a_p, dinv_p


def init_sage_params(key, c_in, c_out):
    k1, k2, k3 = jax.random.split(key, 3)
    scale = 1.0 / jnp.sqrt(jnp.float32(c_in))
    w_l = jax.random.uniform(k1, (c_in, c_out), jnp.float32, -scale, scale)
    w_r = jax.random.uniform(k2, (c_in, c_out), jnp.float32, -scale, scale)
    b = jax.random.uniform(k3, (1, c_out), jnp.float32, -scale, scale)
    return w_l, w_r, b


def node_encoder_forward(params, x, edge_index, *, tile=1024):
    n, c_in = x.shape
    assert tile % 128 == 0

    # Clamp the tile for small graphs.  With TM == TK (or TK % TM == 0) the
    # padded node count is simply round_up(n, tile) -- no lcm blow-up.
    tile = max(128, min(tile, _round_up(n, 128)))
    np_ = _round_up(n, tile)
    tk = tile
    tm = tile
    # v7x megacore: prefer >= 2 row tiles so both TensorCores get work
    # (tk % tm == 0 is preserved, so np_ stays divisible by both tiles).
    if np_ // tm < 2 and tm >= 256:
        tm //= 2

    a_p, dinv_p = build_padded_graph(edge_index, n, np_)

    c_in_p = _round_up(c_in, 128)
    h = jnp.zeros((np_, c_in_p), jnp.bfloat16)
    h = h.at[:n, :c_in].set(x.astype(jnp.bfloat16))

    n_layers = len(params)
    for li, (w_l, w_r, b) in enumerate(params):
        last = li == n_layers - 1
        c_cur_p = h.shape[1]
        c_i, c_o = w_l.shape
        c_out_p = _round_up(c_o, 128)
        if c_out_p < c_cur_p:
            # Aggregate in the narrower projected space: project X @ W_l once
            # up front (exact -- the per-row mean normalization commutes with
            # the right projection), halving the aggregation width.
            wl_p = jnp.zeros((c_cur_p, c_out_p), jnp.bfloat16)
            wl_p = wl_p.at[:c_i, :c_o].set(w_l.astype(jnp.bfloat16))
            x_agg = jnp.dot(h, wl_p,
                            preferred_element_type=jnp.float32
                            ).astype(jnp.bfloat16)
            w_l_arg = None
        else:
            x_agg = h
            w_l_arg = w_l
        h = sage_conv_padded(
            a_p, dinv_p, x_agg, h, w_l_arg, w_r, b,
            relu=not last,
            out_dtype=jnp.float32 if last else jnp.bfloat16,
            tm=tm, tk=tk)

    c_out_final = params[-1][0].shape[1]
    return h[:n, :c_out_final]


# ---------------------------------------------------------------------------
# Reference (pure JAX, f32) for a sanity check
# ---------------------------------------------------------------------------
def node_encoder_ref(params, x, edge_index):
    n = x.shape[0]
    src, dst = edge_index[0], edge_index[1]
    a = jnp.zeros((n, n), jnp.float32).at[dst, src].add(1.0)
    deg = jnp.maximum(jnp.sum(a, axis=1, keepdims=True), 1.0)
    a_norm = a / deg

    def layer(h, w_l, w_r, b):
        return (a_norm @ h) @ w_l + h @ w_r + b

    h = x
    for i, (w_l, w_r, b) in enumerate(params):
        h = layer(h, w_l, w_r, b)
        if i < len(params) - 1:
            h = jax.nn.relu(h)
    return h


if __name__ == "__main__":
    key = jax.random.PRNGKey(0)
    k_x, k_e, k_p1, k_p2, k_p3 = jax.random.split(key, 5)

    # Small graph: N=64 nodes, in_channel=4, encode_size=128 (module default).
    num_nodes = 64
    in_channel = 4
    encode_size = 128

    x = jax.random.normal(k_x, (num_nodes, in_channel), jnp.float32)

    # Bidirectional ring + one random permutation of extra edges.
    src = jnp.arange(num_nodes, dtype=jnp.int32)
    dst = (src + 1) % num_nodes
    perm = jax.random.permutation(k_e, num_nodes).astype(jnp.int32)
    edge_index = jnp.concatenate(
        [jnp.stack([src, dst]), jnp.stack([dst, src]), jnp.stack([src, perm])],
        axis=1,
    )

    params = (
        init_sage_params(k_p1, in_channel, 256),
        init_sage_params(k_p2, 256, 128),
        init_sage_params(k_p3, 128, encode_size),
    )

    fwd = jax.jit(node_encoder_forward)
    out = fwd(params, x, edge_index)
    out = jax.block_until_ready(out)

    ref = node_encoder_ref(params, x, edge_index)
    assert out.shape == (num_nodes, encode_size), out.shape
    # bf16 matmul operands with f32 accumulation -> loose tolerance vs f32 ref.
    assert jnp.allclose(out, ref, atol=5e-2, rtol=5e-2), (
        float(jnp.max(jnp.abs(out - ref)))
    )

    print("KERNEL_OK")
</pallas_src>

<mosaic_0001>
module attributes {stable_mosaic.version = 11 : i64} {
  func.func private @main(%arg0: i32) attributes {dimension_semantics = [#tpu.dimension_semantics<core_parallel>], iteration_bounds = array<i64: 2>, tpu.core_type = #tpu.core_type<sc_scalar_subcore>, window_params = []} {
    return
  }
}

module attributes {stable_mosaic.version = 11 : i64} {
  func.func private @main(%arg0: i32) attributes {dimension_semantics = [#tpu.dimension_semantics<core_parallel>], iteration_bounds = array<i64: 2>, tpu.core_type = #tpu.core_type<sc_scalar_subcore>, window_params = []} {
    return
  }
}

module attributes {stable_mosaic.version = 11 : i64} {
  func.func @_sage_post_kernel(%arg0: i32, %arg1: i32, %arg2: memref<128x128xbf16, #tpu.memory_space<vmem>>, %arg3: memref<128x128xbf16, #tpu.memory_space<vmem>>, %arg4: memref<128x128xbf16, #tpu.memory_space<vmem>>, %arg5: memref<128x1xf32, #tpu.memory_space<vmem>>, %arg6: memref<128x256xbf16, #tpu.memory_space<vmem>>, %arg7: memref<128x256xbf16, #tpu.memory_space<vmem>>, %arg8: memref<1x256xf32, #tpu.memory_space<vmem>>, %arg9: memref<128x256xbf16, #tpu.memory_space<vmem>>, %arg10: memref<128x128xf32, #tpu.memory_space<vmem>>) attributes {dimension_semantics = [#tpu.dimension_semantics<parallel>, #tpu.dimension_semantics<arbitrary>], iteration_bounds = array<i64: 1, 1>, scalar_prefetch = 0 : i64, scratch_operands = 1 : i64, tpu.core_type = #tpu.core_type<tc>, window_params = [{transform_indices = @transform_0, window_bounds = array<i64: 128, 128>}, {transform_indices = @transform_1, window_bounds = array<i64: 128, 128>}, {transform_indices = @transform_2, window_bounds = array<i64: 128, 128>}, {transform_indices = @transform_3, window_bounds = array<i64: 128, 1>}, {pipeline_mode = #tpu.pipeline_mode<synchronous>, transform_indices = @transform_4, window_bounds = array<i64: 128, 256>}, {pipeline_mode = #tpu.pipeline_mode<synchronous>, transform_indices = @transform_5, window_bounds = array<i64: 128, 256>}, {pipeline_mode = #tpu.pipeline_mode<synchronous>, transform_indices = @transform_6, window_bounds = array<i64: 1, 256>}, {transform_indices = @transform_7, window_bounds = array<i64: 128, 256>}]} {
    %c0_i32 = arith.constant 0 : i32
    %0 = arith.cmpi eq, %arg1, %c0_i32 : i32
    %1 = arith.extui %0 : i1 to i32
    %c0_i32_0 = arith.constant 0 : i32
    %2 = arith.cmpi ne, %1, %c0_i32_0 : i32
    scf.if %2 {
      %cst_10 = arith.constant 0.000000e+00 : f32
      %12 = vector.broadcast %cst_10 : f32 to vector<128x128xf32>
      %c0_11 = arith.constant 0 : index
      %c0_12 = arith.constant 0 : index
      %13 = vector.load %arg10[%c0_11, %c0_12] : memref<128x128xf32, #tpu.memory_space<vmem>>, vector<128x128xf32>
      tpu.vector_store %arg10[%c0_11, %c0_12], %12 {strides = array<i32>} : memref<128x128xf32, #tpu.memory_space<vmem>>, vector<128x128xf32>,
    } else {
    }
    %c0 = arith.constant 0 : index
    %c0_1 = arith.constant 0 : index
    %3 = vector.load %arg10[%c0, %c0_1] : memref<128x128xf32, #tpu.memory_space<vmem>>, vector<128x128xf32>
    %c0_2 = arith.constant 0 : index
    %c0_3 = arith.constant 0 : index
    %4 = vector.load %arg2[%c0_2, %c0_3] : memref<128x128xbf16, #tpu.memory_space<vmem>>, vector<128x128xbf16>
    %c0_4 = arith.constant 0 : index
    %c0_5 = arith.constant 0 : index
    %5 = vector.load %arg3[%c0_4, %c0_5] : memref<128x128xbf16, #tpu.memory_space<vmem>>, vector<128x128xbf16>
    %cst = arith.constant dense<0.000000e+00> : vector<128x128xf32>
    %6 = tpu.matmul %4, %5, %cst {dimension_numbers = #tpu.dot_dimension_numbers<[1], [0], [0], [1], [0, 0, 1, 1], [], []>} : vector<128x128xbf16>, vector<128x128xbf16>, vector<128x128xf32> -> vector<128x128xf32>
    %7 = arith.addf %3, %6 : vector<128x128xf32>
    %c0_6 = arith.constant 0 : index
    %c0_7 = arith.constant 0 : index
    %8 = vector.load %arg10[%c0_6, %c0_7] : memref<128x128xf32, #tpu.memory_space<vmem>>, vector<128x128xf32>
    tpu.vector_store %arg10[%c0_6, %c0_7], %7 {strides = array<i32>} : memref<128x128xf32, #tpu.memory_space<vmem>>, vector<128x128xf32>,
    %c0_i32_8 = arith.constant 0 : i32
    %9 = arith.cmpi eq, %arg1, %c0_i32_8 : i32
    %10 = arith.extui %9 : i1 to i32
    %c0_i32_9 = arith.constant 0 : i32
    %11 = arith.cmpi ne, %10, %c0_i32_9 : i32
    scf.if %11 {
      %c0_10 = arith.constant 0 : index
      %c0_11 = arith.constant 0 : index
      %12 = vector.load %arg10[%c0_10, %c0_11] : memref<128x128xf32, #tpu.memory_space<vmem>>, vector<128x128xf32>
      %c0_12 = arith.constant 0 : index
      %c0_13 = arith.constant 0 : index
      %13 = vector.load %arg5[%c0_12, %c0_13] : memref<128x1xf32, #tpu.memory_space<vmem>>, vector<128x1xf32>
      %14 = vector.broadcast %13 : vector<128x1xf32> to vector<128x128xf32>
      %15 = arith.mulf %12, %14 : vector<128x128xf32>
      %16 = arith.truncf %15 : vector<128x128xf32> to vector<128x128xbf16>
      %c0_14 = arith.constant 0 : index
      %c0_15 = arith.constant 0 : index
      %17 = vector.load %arg6[%c0_14, %c0_15] : memref<128x256xbf16, #tpu.memory_space<vmem>>, vector<128x256xbf16>
      %cst_16 = arith.constant dense<0.000000e+00> : vector<128x256xf32>
      %18 = tpu.matmul %16, %17, %cst_16 {dimension_numbers = #tpu.dot_dimension_numbers<[1], [0], [0], [1], [0, 0, 1, 1], [], []>} : vector<128x128xbf16>, vector<128x256xbf16>, vector<128x256xf32> -> vector<128x256xf32>
      %c0_17 = arith.constant 0 : index
      %c0_18 = arith.constant 0 : index
      %19 = vector.load %arg4[%c0_17, %c0_18] : memref<128x128xbf16, #tpu.memory_space<vmem>>, vector<128x128xbf16>
      %c0_19 = arith.constant 0 : index
      %c0_20 = arith.constant 0 : index
      %20 = vector.load %arg7[%c0_19, %c0_20] : memref<128x256xbf16, #tpu.memory_space<vmem>>, vector<128x256xbf16>
      %cst_21 = arith.constant dense<0.000000e+00> : vector<128x256xf32>
      %21 = tpu.matmul %19, %20, %cst_21 {dimension_numbers = #tpu.dot_dimension_numbers<[1], [0], [0], [1], [0, 0, 1, 1], [], []>} : vector<128x128xbf16>, vector<128x256xbf16>, vector<128x256xf32> -> vector<128x256xf32>
      %22 = arith.addf %18, %21 : vector<128x256xf32>
      %c0_22 = arith.constant 0 : index
      %c0_23 = arith.constant 0 : index
      %23 = vector.load %arg8[%c0_22, %c0_23] : memref<1x256xf32, #tpu.memory_space<vmem>>, vector<1x256xf32>
      %24 = vector.broadcast %23 : vector<1x256xf32> to vector<128x256xf32>
      %25 = arith.addf %22, %24 : vector<128x256xf32>
      %cst_24 = arith.constant 0.000000e+00 : f32
      %26 = vector.broadcast %cst_24 : f32 to vector<128x256xf32>
      %27 = arith.maximumf %25, %26 : vector<128x256xf32>
      %28 = arith.truncf %27 : vector<128x256xf32> to vector<128x256xbf16>
      %c0_25 = arith.constant 0 : index
      %c0_26 = arith.constant 0 : index
      %29 = vector.load %arg9[%c0_25, %c0_26] : memref<128x256xbf16, #tpu.memory_space<vmem>>, vector<128x256xbf16>
      tpu.vector_store %arg9[%c0_25, %c0_26], %28 {strides = array<i32>} : memref<128x256xbf16, #tpu.memory_space<vmem>>, vector<128x256xbf16>,
    } else {
    }
    return
  }
  func.func @transform_0(%arg0: i32, %arg1: i32) -> (i32, i32) {
    %c0_i32 = arith.constant 0 : i32
    return %arg0, %arg1 : i32, i32
  }
  func.func @transform_1(%arg0: i32, %arg1: i32) -> (i32, i32) {
    %c0_i32 = arith.constant 0 : i32
    %c0_i32_0 = arith.constant 0 : i32
    return %arg1, %c0_i32 : i32, i32
  }
  func.func @transform_2(%arg0: i32, %arg1: i32) -> (i32, i32) {
    %c0_i32 = arith.constant 0 : i32
    %c0_i32_0 = arith.constant 0 : i32
    return %arg0, %c0_i32 : i32, i32
  }
  func.func @transform_3(%arg0: i32, %arg1: i32) -> (i32, i32) {
    %c0_i32 = arith.constant 0 : i32
    %c0_i32_0 = arith.constant 0 : i32
    return %arg0, %c0_i32 : i32, i32
  }
  func.func @transform_4(%arg0: i32, %arg1: i32) -> (i32, i32) {
    %c0_i32 = arith.constant 0 : i32
    %c0_i32_0 = arith.constant 0 : i32
    %c0_i32_1 = arith.constant 0 : i32
    return %c0_i32, %c0_i32_0 : i32, i32
  }
  func.func @transform_5(%arg0: i32, %arg1: i32) -> (i32, i32) {
    %c0_i32 = arith.constant 0 : i32
    %c0_i32_0 = arith.constant 0 : i32
    %c0_i32_1 = arith.constant 0 : i32
    return %c0_i32, %c0_i32_0 : i32, i32
  }
  func.func @transform_6(%arg0: i32, %arg1: i32) -> (i32, i32) {
    %c0_i32 = arith.constant 0 : i32
    %c0_i32_0 = arith.constant 0 : i32
    %c0_i32_1 = arith.constant 0 : i32
    return %c0_i32, %c0_i32_0 : i32, i32
  }
  func.func @transform_7(%arg0: i32, %arg1: i32) -> (i32, i32) {
    %c0_i32 = arith.constant 0 : i32
    %c0_i32_0 = arith.constant 0 : i32
    return %arg0, %c0_i32 : i32, i32
  }
}

module attributes {stable_mosaic.version = 11 : i64} {
  func.func @_sage_post_kernel(%arg0: i32, %arg1: i32, %arg2: memref<128x128xbf16, #tpu.memory_space<vmem>>, %arg3: memref<128x128xbf16, #tpu.memory_space<vmem>>, %arg4: memref<128x128xbf16, #tpu.memory_space<vmem>>, %arg5: memref<128x1xf32, #tpu.memory_space<vmem>>, %arg6: memref<128x128xbf16, #tpu.memory_space<vmem>>, %arg7: memref<128x128xbf16, #tpu.memory_space<vmem>>, %arg8: memref<1x128xf32, #tpu.memory_space<vmem>>, %arg9: memref<128x128xf32, #tpu.memory_space<vmem>>, %arg10: memref<128x128xf32, #tpu.memory_space<vmem>>) attributes {dimension_semantics = [#tpu.dimension_semantics<parallel>, #tpu.dimension_semantics<arbitrary>], iteration_bounds = array<i64: 1, 1>, scalar_prefetch = 0 : i64, scratch_operands = 1 : i64, tpu.core_type = #tpu.core_type<tc>, window_params = [{transform_indices = @transform_0, window_bounds = array<i64: 128, 128>}, {transform_indices = @transform_1, window_bounds = array<i64: 128, 128>}, {transform_indices = @transform_2, window_bounds = array<i64: 128, 128>}, {transform_indices = @transform_3, window_bounds = array<i64: 128, 1>}, {pipeline_mode = #tpu.pipeline_mode<synchronous>, transform_indices = @transform_4, window_bounds = array<i64: 128, 128>}, {pipeline_mode = #tpu.pipeline_mode<synchronous>, transform_indices = @transform_5, window_bounds = array<i64: 128, 128>}, {pipeline_mode = #tpu.pipeline_mode<synchronous>, transform_indices = @transform_6, window_bounds = array<i64: 1, 128>}, {transform_indices = @transform_7, window_bounds = array<i64: 128, 128>}]} {
    %c0_i32 = arith.constant 0 : i32
    %0 = arith.cmpi eq, %arg1, %c0_i32 : i32
    %1 = arith.extui %0 : i1 to i32
    %c0_i32_0 = arith.constant 0 : i32
    %2 = arith.cmpi ne, %1, %c0_i32_0 : i32
    scf.if %2 {
      %cst_10 = arith.constant 0.000000e+00 : f32
      %12 = vector.broadcast %cst_10 : f32 to vector<128x128xf32>
      %c0_11 = arith.constant 0 : index
      %c0_12 = arith.constant 0 : index
      %13 = vector.load %arg10[%c0_11, %c0_12] : memref<128x128xf32, #tpu.memory_space<vmem>>, vector<128x128xf32>
      tpu.vector_store %arg10[%c0_11, %c0_12], %12 {strides = array<i32>} : memref<128x128xf32, #tpu.memory_space<vmem>>, vector<128x128xf32>,
    } else {
    }
    %c0 = arith.constant 0 : index
    %c0_1 = arith.constant 0 : index
    %3 = vector.load %arg10[%c0, %c0_1] : memref<128x128xf32, #tpu.memory_space<vmem>>, vector<128x128xf32>
    %c0_2 = arith.constant 0 : index
    %c0_3 = arith.constant 0 : index
    %4 = vector.load %arg2[%c0_2, %c0_3] : memref<128x128xbf16, #tpu.memory_space<vmem>>, vector<128x128xbf16>
    %c0_4 = arith.constant 0 : index
    %c0_5 = arith.constant 0 : index
    %5 = vector.load %arg3[%c0_4, %c0_5] : memref<128x128xbf16, #tpu.memory_space<vmem>>, vector<128x128xbf16>
    %cst = arith.constant dense<0.000000e+00> : vector<128x128xf32>
    %6 = tpu.matmul %4, %5, %cst {dimension_numbers = #tpu.dot_dimension_numbers<[1], [0], [0], [1], [0, 0, 1, 1], [], []>} : vector<128x128xbf16>, vector<128x128xbf16>, vector<128x128xf32> -> vector<128x128xf32>
    %7 = arith.addf %3, %6 : vector<128x128xf32>
    %c0_6 = arith.constant 0 : index
    %c0_7 = arith.constant 0 : index
    %8 = vector.load %arg10[%c0_6, %c0_7] : memref<128x128xf32, #tpu.memory_space<vmem>>, vector<128x128xf32>
    tpu.vector_store %arg10[%c0_6, %c0_7], %7 {strides = array<i32>} : memref<128x128xf32, #tpu.memory_space<vmem>>, vector<128x128xf32>,
    %c0_i32_8 = arith.constant 0 : i32
    %9 = arith.cmpi eq, %arg1, %c0_i32_8 : i32
    %10 = arith.extui %9 : i1 to i32
    %c0_i32_9 = arith.constant 0 : i32
    %11 = arith.cmpi ne, %10, %c0_i32_9 : i32
    scf.if %11 {
      %c0_10 = arith.constant 0 : index
      %c0_11 = arith.constant 0 : index
      %12 = vector.load %arg10[%c0_10, %c0_11] : memref<128x128xf32, #tpu.memory_space<vmem>>, vector<128x128xf32>
      %c0_12 = arith.constant 0 : index
      %c0_13 = arith.constant 0 : index
      %13 = vector.load %arg5[%c0_12, %c0_13] : memref<128x1xf32, #tpu.memory_space<vmem>>, vector<128x1xf32>
      %14 = vector.broadcast %13 : vector<128x1xf32> to vector<128x128xf32>
      %15 = arith.mulf %12, %14 : vector<128x128xf32>
      %16 = arith.truncf %15 : vector<128x128xf32> to vector<128x128xbf16>
      %c0_14 = arith.constant 0 : index
      %c0_15 = arith.constant 0 : index
      %17 = vector.load %arg6[%c0_14, %c0_15] : memref<128x128xbf16, #tpu.memory_space<vmem>>, vector<128x128xbf16>
      %cst_16 = arith.constant dense<0.000000e+00> : vector<128x128xf32>
      %18 = tpu.matmul %16, %17, %cst_16 {dimension_numbers = #tpu.dot_dimension_numbers<[1], [0], [0], [1], [0, 0, 1, 1], [], []>} : vector<128x128xbf16>, vector<128x128xbf16>, vector<128x128xf32> -> vector<128x128xf32>
      %c0_17 = arith.constant 0 : index
      %c0_18 = arith.constant 0 : index
      %19 = vector.load %arg4[%c0_17, %c0_18] : memref<128x128xbf16, #tpu.memory_space<vmem>>, vector<128x128xbf16>
      %c0_19 = arith.constant 0 : index
      %c0_20 = arith.constant 0 : index
      %20 = vector.load %arg7[%c0_19, %c0_20] : memref<128x128xbf16, #tpu.memory_space<vmem>>, vector<128x128xbf16>
      %cst_21 = arith.constant dense<0.000000e+00> : vector<128x128xf32>
      %21 = tpu.matmul %19, %20, %cst_21 {dimension_numbers = #tpu.dot_dimension_numbers<[1], [0], [0], [1], [0, 0, 1, 1], [], []>} : vector<128x128xbf16>, vector<128x128xbf16>, vector<128x128xf32> -> vector<128x128xf32>
      %22 = arith.addf %18, %21 : vector<128x128xf32>
      %c0_22 = arith.constant 0 : index
      %c0_23 = arith.constant 0 : index
      %23 = vector.load %arg8[%c0_22, %c0_23] : memref<1x128xf32, #tpu.memory_space<vmem>>, vector<1x128xf32>
      %24 = vector.broadcast %23 : vector<1x128xf32> to vector<128x128xf32>
      %25 = arith.addf %22, %24 : vector<128x128xf32>
      %c0_24 = arith.constant 0 : index
      %c0_25 = arith.constant 0 : index
      %26 = vector.load %arg9[%c0_24, %c0_25] : memref<128x128xf32, #tpu.memory_space<vmem>>, vector<128x128xf32>
      tpu.vector_store %arg9[%c0_24, %c0_25], %25 {strides = array<i32>} : memref<128x128xf32, #tpu.memory_space<vmem>>, vector<128x128xf32>,
    } else {
    }
    return
  }
  func.func @transform_0(%arg0: i32, %arg1: i32) -> (i32, i32) {
    %c0_i32 = arith.constant 0 : i32
    return %arg0, %arg1 : i32, i32
  }
  func.func @transform_1(%arg0: i32, %arg1: i32) -> (i32, i32) {
    %c0_i32 = arith.constant 0 : i32
    %c0_i32_0 = arith.constant 0 : i32
    return %arg1, %c0_i32 : i32, i32
  }
  func.func @transform_2(%arg0: i32, %arg1: i32) -> (i32, i32) {
    %c0_i32 = arith.constant 0 : i32
    %c0_i32_0 = arith.constant 0 : i32
    return %arg0, %c0_i32 : i32, i32
  }
  func.func @transform_3(%arg0: i32, %arg1: i32) -> (i32, i32) {
    %c0_i32 = arith.constant 0 : i32
    %c0_i32_0 = arith.constant 0 : i32
    return %arg0, %c0_i32 : i32, i32
  }
  func.func @transform_4(%arg0: i32, %arg1: i32) -> (i32, i32) {
    %c0_i32 = arith.constant 0 : i32
    %c0_i32_0 = arith.constant 0 : i32
    %c0_i32_1 = arith.constant 0 : i32
    return %c0_i32, %c0_i32_0 : i32, i32
  }
  func.func @transform_5(%arg0: i32, %arg1: i32) -> (i32, i32) {
    %c0_i32 = arith.constant 0 : i32
    %c0_i32_0 = arith.constant 0 : i32
    %c0_i32_1 = arith.constant 0 : i32
    return %c0_i32, %c0_i32_0 : i32, i32
  }
  func.func @transform_6(%arg0: i32, %arg1: i32) -> (i32, i32) {
    %c0_i32 = arith.constant 0 : i32
    %c0_i32_0 = arith.constant 0 : i32
    %c0_i32_1 = arith.constant 0 : i32
    return %c0_i32, %c0_i32_0 : i32, i32
  }
  func.func @transform_7(%arg0: i32, %arg1: i32) -> (i32, i32) {
    %c0_i32 = arith.constant 0 : i32
    %c0_i32_0 = arith.constant 0 : i32
    return %arg0, %c0_i32 : i32, i32
  }
}

module attributes {stable_mosaic.version = 11 : i64} {
  func.func @_sage_pre_kernel(%arg0: i32, %arg1: i32, %arg2: memref<128x128xbf16, #tpu.memory_space<vmem>>, %arg3: memref<128x128xbf16, #tpu.memory_space<vmem>>, %arg4: memref<128x256xbf16, #tpu.memory_space<vmem>>, %arg5: memref<128x1xf32, #tpu.memory_space<vmem>>, %arg6: memref<256x128xbf16, #tpu.memory_space<vmem>>, %arg7: memref<1x128xf32, #tpu.memory_space<vmem>>, %arg8: memref<128x128xbf16, #tpu.memory_space<vmem>>, %arg9: memref<128x128xf32, #tpu.memory_space<vmem>>) attributes {dimension_semantics = [#tpu.dimension_semantics<parallel>, #tpu.dimension_semantics<arbitrary>], iteration_bounds = array<i64: 1, 1>, scalar_prefetch = 0 : i64, scratch_operands = 1 : i64, tpu.core_type = #tpu.core_type<tc>, window_params = [{transform_indices = @transform_0, window_bounds = array<i64: 128, 128>}, {transform_indices = @transform_1, window_bounds = array<i64: 128, 128>}, {transform_indices = @transform_2, window_bounds = array<i64: 128, 256>}, {transform_indices = @transform_3, window_bounds = array<i64: 128, 1>}, {pipeline_mode = #tpu.pipeline_mode<synchronous>, transform_indices = @transform_4, window_bounds = array<i64: 256, 128>}, {pipeline_mode = #tpu.pipeline_mode<synchronous>, transform_indices = @transform_5, window_bounds = array<i64: 1, 128>}, {transform_indices = @transform_6, window_bounds = array<i64: 128, 128>}]} {
    %c0_i32 = arith.constant 0 : i32
    %0 = arith.cmpi eq, %arg1, %c0_i32 : i32
    %1 = arith.extui %0 : i1 to i32
    %c0_i32_0 = arith.constant 0 : i32
    %2 = arith.cmpi ne, %1, %c0_i32_0 : i32
    scf.if %2 {
      %cst_10 = arith.constant 0.000000e+00 : f32
      %12 = vector.broadcast %cst_10 : f32 to vector<128x128xf32>
      %c0_11 = arith.constant 0 : index
      %c0_12 = arith.constant 0 : index
      %13 = vector.load %arg9[%c0_11, %c0_12] : memref<128x128xf32, #tpu.memory_space<vmem>>, vector<128x128xf32>
      tpu.vector_store %arg9[%c0_11, %c0_12], %12 {strides = array<i32>} : memref<128x128xf32, #tpu.memory_space<vmem>>, vector<128x128xf32>,
    } else {
    }
    %c0 = arith.constant 0 : index
    %c0_1 = arith.constant 0 : index
    %3 = vector.load %arg9[%c0, %c0_1] : memref<128x128xf32, #tpu.memory_space<vmem>>, vector<128x128xf32>
    %c0_2 = arith.constant 0 : index
    %c0_3 = arith.constant 0 : index
    %4 = vector.load %arg2[%c0_2, %c0_3] : memref<128x128xbf16, #tpu.memory_space<vmem>>, vector<128x128xbf16>
    %c0_4 = arith.constant 0 : index
    %c0_5 = arith.constant 0 : index
    %5 = vector.load %arg3[%c0_4, %c0_5] : memref<128x128xbf16, #tpu.memory_space<vmem>>, vector<128x128xbf16>
    %cst = arith.constant dense<0.000000e+00> : vector<128x128xf32>
    %6 = tpu.matmul %4, %5, %cst {dimension_numbers = #tpu.dot_dimension_numbers<[1], [0], [0], [1], [0, 0, 1, 1], [], []>} : vector<128x128xbf16>, vector<128x128xbf16>, vector<128x128xf32> -> vector<128x128xf32>
    %7 = arith.addf %3, %6 : vector<128x128xf32>
    %c0_6 = arith.constant 0 : index
    %c0_7 = arith.constant 0 : index
    %8 = vector.load %arg9[%c0_6, %c0_7] : memref<128x128xf32, #tpu.memory_space<vmem>>, vector<128x128xf32>
    tpu.vector_store %arg9[%c0_6, %c0_7], %7 {strides = array<i32>} : memref<128x128xf32, #tpu.memory_space<vmem>>, vector<128x128xf32>,
    %c0_i32_8 = arith.constant 0 : i32
    %9 = arith.cmpi eq, %arg1, %c0_i32_8 : i32
    %10 = arith.extui %9 : i1 to i32
    %c0_i32_9 = arith.constant 0 : i32
    %11 = arith.cmpi ne, %10, %c0_i32_9 : i32
    scf.if %11 {
      %c0_10 = arith.constant 0 : index
      %c0_11 = arith.constant 0 : index
      %12 = vector.load %arg9[%c0_10, %c0_11] : memref<128x128xf32, #tpu.memory_space<vmem>>, vector<128x128xf32>
      %c0_12 = arith.constant 0 : index
      %c0_13 = arith.constant 0 : index
      %13 = vector.load %arg5[%c0_12, %c0_13] : memref<128x1xf32, #tpu.memory_space<vmem>>, vector<128x1xf32>
      %14 = vector.broadcast %13 : vector<128x1xf32> to vector<128x128xf32>
      %15 = arith.mulf %12, %14 : vector<128x128xf32>
      %c0_14 = arith.constant 0 : index
      %c0_15 = arith.constant 0 : index
      %16 = vector.load %arg4[%c0_14, %c0_15] : memref<128x256xbf16, #tpu.memory_space<vmem>>, vector<128x256xbf16>
      %c0_16 = arith.constant 0 : index
      %c0_17 = arith.constant 0 : index
      %17 = vector.load %arg6[%c0_16, %c0_17] : memref<256x128xbf16, #tpu.memory_space<vmem>>, vector<256x128xbf16>
      %cst_18 = arith.constant dense<0.000000e+00> : vector<128x128xf32>
      %18 = tpu.matmul %16, %17, %cst_18 {dimension_numbers = #tpu.dot_dimension_numbers<[1], [0], [0], [1], [0, 0, 1, 1], [], []>} : vector<128x256xbf16>, vector<256x128xbf16>, vector<128x128xf32> -> vector<128x128xf32>
      %19 = arith.addf %15, %18 : vector<128x128xf32>
      %c0_19 = arith.constant 0 : index
      %c0_20 = arith.constant 0 : index
      %20 = vector.load %arg7[%c0_19, %c0_20] : memref<1x128xf32, #tpu.memory_space<vmem>>, vector<1x128xf32>
      %21 = vector.broadcast %20 : vector<1x128xf32> to vector<128x128xf32>
      %22 = arith.addf %19, %21 : vector<128x128xf32>
      %cst_21 = arith.constant 0.000000e+00 : f32
      %23 = vector.broadcast %cst_21 : f32 to vector<128x128xf32>
      %24 = arith.maximumf %22, %23 : vector<128x128xf32>
      %25 = arith.truncf %24 : vector<128x128xf32> to vector<128x128xbf16>
      %c0_22 = arith.constant 0 : index
      %c0_23 = arith.constant 0 : index
      %26 = vector.load %arg8[%c0_22, %c0_23] : memref<128x128xbf16, #tpu.memory_space<vmem>>, vector<128x128xbf16>
      tpu.vector_store %arg8[%c0_22, %c0_23], %25 {strides = array<i32>} : memref<128x128xbf16, #tpu.memory_space<vmem>>, vector<128x128xbf16>,
    } else {
    }
    return
  }
  func.func @transform_0(%arg0: i32, %arg1: i32) -> (i32, i32) {
    %c0_i32 = arith.constant 0 : i32
    return %arg0, %arg1 : i32, i32
  }
  func.func @transform_1(%arg0: i32, %arg1: i32) -> (i32, i32) {
    %c0_i32 = arith.constant 0 : i32
    %c0_i32_0 = arith.constant 0 : i32
    return %arg1, %c0_i32 : i32, i32
  }
  func.func @transform_2(%arg0: i32, %arg1: i32) -> (i32, i32) {
    %c0_i32 = arith.constant 0 : i32
    %c0_i32_0 = arith.constant 0 : i32
    return %arg0, %c0_i32 : i32, i32
  }
  func.func @transform_3(%arg0: i32, %arg1: i32) -> (i32, i32) {
    %c0_i32 = arith.constant 0 : i32
    %c0_i32_0 = arith.constant 0 : i32
    return %arg0, %c0_i32 : i32, i32
  }
  func.func @transform_4(%arg0: i32, %arg1: i32) -> (i32, i32) {
    %c0_i32 = arith.constant 0 : i32
    %c0_i32_0 = arith.constant 0 : i32
    %c0_i32_1 = arith.constant 0 : i32
    return %c0_i32, %c0_i32_0 : i32, i32
  }
  func.func @transform_5(%arg0: i32, %arg1: i32) -> (i32, i32) {
    %c0_i32 = arith.constant 0 : i32
    %c0_i32_0 = arith.constant 0 : i32
    %c0_i32_1 = arith.constant 0 : i32
    return %c0_i32, %c0_i32_0 : i32, i32
  }
  func.func @transform_6(%arg0: i32, %arg1: i32) -> (i32, i32) {
    %c0_i32 = arith.constant 0 : i32
    %c0_i32_0 = arith.constant 0 : i32
    return %arg0, %c0_i32 : i32, i32
  }
}

</mosaic_0001>

<bundles_post_ra>
// kernel: node_encoder_forward.5
= control target key start
LH: loop header
LB: loop body
LE: loop exit
PB: predicated region body
PF: predicated region fallthrough
CT: control target
= control target key end

     0   :  { %v1148_v1 = vmov 0   ;;  %s1414_s1 = inlined_call_operand.vmem [shape: bf16[128,128], index: 1, kind: input, shape index: {}, may-alias: {1,2}]   ;;  %s1415_s0 = inlined_call_operand.vmem [shape: bf16[128,128], index: 0, kind: input, shape index: {}]   ;;  %s1416_s3 = inlined_call_operand.vmem [shape: f32[128,1], index: 3, kind: input, shape index: {}]   ;;  %s1417_s5 = inlined_call_operand.vmem [shape: bf16[128,128], index: 5, kind: input, shape index: {}]   ;;  %s1418_s4 = inlined_call_operand.vmem [shape: bf16[128,128], index: 4, kind: input, shape index: {}]   ;;  %s1419_s2 = inlined_call_operand.vmem [shape: bf16[128,128], index: 2, kind: input, shape index: {}, may-alias: {1,2}]   ;;  %s1420_s6 = inlined_call_operand.vmem [shape: f32[1,128], index: 6, kind: input, shape index: {}]   ;;  %s1421_s7 = inlined_call_operand.vmem [shape: f32[128,128], index: 7, kind: output, shape index: {}]  }
   0x1   :  { %v1108_v0 = vld [vmem:[%s1414_s1] sm:$0xff]   ;;  %1107 = vset.pattern.permute.xlu1 %v1148_v1  ;;  %1106 = vset.pattern.permute.xlu0 %v1148_v1  ;;  %v1109_v2 = vld [vmem:[%s1414_s1 + $0x8] sm:$0xff]   ;;  %v1110_v3 = vld [vmem:[%s1414_s1 + $0x10] sm:$0xff]  }
   0x2   :  { %977 = vmatprep.subr.bf16.mxu0 %v1108_v0  ;;  %v1111_v4 = vld [vmem:[%s1414_s1 + $0x18] sm:$0xff]   ;;  %v1116_v5 = vld [vmem:[%s1415_s0] sm:$0xff]   ;;  %v1113_v7 = vld [vmem:[%s1414_s1 + $0x28] sm:$0xff]  }
   0x3   :  { %978 = vmatpush3.bf16.msra.mxu0 %v1108_v0  ;;  %993 = vmatprep.mubr.bf16.mxu0 %v1116_v5  ;;  %v1112_v6 = vld [vmem:[%s1414_s1 + $0x20] sm:$0xff]   ;;  %v341_v8 = vld [vmem:[%s1416_s3 + $0x10] sm:$0xff]  ;;  %v342_v10 = vld [vmem:[%s1416_s3 + $0x18] sm:$0xff] }
   0x4   :  { %979 = vmatprep.subr.bf16.mxu0 %v1109_v2  ;;  %v339_v9 = vld [vmem:[%s1416_s3] sm:$0xff]  ;;  %367 = vperm.xlu1 %1107, %v341_v8   ;;  %v340_v11 = vld [vmem:[%s1416_s3 + $0x8] sm:$0xff]  ;;  %v1114_v12 = vld [vmem:[%s1414_s1 + $0x30] sm:$0xff]  }
   0x5   :  { %357 = vperm.xlu0 %1106, %v339_v9   ;;  %v348_v13 = vld [vmem:[%s1416_s3 + $0x48] sm:$0xff]  ;;  %v347_v14 = vld [vmem:[%s1416_s3 + $0x40] sm:$0xff]  ;;  %v1115_v17 = vld [vmem:[%s1414_s1 + $0x38] sm:$0xff]  }
   0x6   :  { %v1124_v15 = vld [vmem:[%s1417_s5] sm:$0xff]   ;;  %v1125_v16 = vld [vmem:[%s1417_s5 + $0x8] sm:$0xff]   ;;  %v350_v18 = vld [vmem:[%s1416_s3 + $0x58] sm:$0xff] }
   0x7   :  { %980 = vmatpush3.bf16.msra.mxu0 %v1109_v2  ;;  %1009 = vmatprep.subr.bf16.mxu1 %v1124_v15  ;;  %v349_v19 = vld [vmem:[%s1416_s3 + $0x50] sm:$0xff]  ;;  %v1117_v21 = vld [vmem:[%s1415_s0 + $0x8] sm:$0xff]   ;;  %v1255_v22 = vld [vmem:[%s1418_s4] sm:$0xff]  }
   0x8   :  { %981 = vmatprep.subr.bf16.mxu0 %v1110_v3  ;;  %372 = vperm.xlu1 %1107, %v342_v10   ;;  %v1126_v20 = vld [vmem:[%s1417_s5 + $0x10] sm:$0xff]   ;;  %v344_v24 = vld [vmem:[%s1416_s3 + $0x28] sm:$0xff]  ;;  %v343_v25 = vld [vmem:[%s1416_s3 + $0x20] sm:$0xff] }
   0x9   :  { %362 = vperm.xlu0 %1106, %v340_v11   ;;  %1010 = vmatpush3.bf16.msra.mxu1 %v1124_v15  ;;  %v1118_v23 = vld [vmem:[%s1415_s0 + $0x10] sm:$0xff]   ;;  %v1127_v26 = vld [vmem:[%s1417_s5 + $0x18] sm:$0xff]   ;;  %v1135_v29 = vld [vmem:[%s1419_s2] sm:$0xff]  }
   0xa   :  { %1011 = vmatprep.subr.bf16.mxu1 %v1125_v16  ;;  %v346_v27 = vld [vmem:[%s1416_s3 + $0x38] sm:$0xff]  ;;  %v345_v28 = vld [vmem:[%s1416_s3 + $0x30] sm:$0xff]  ;;  %v1131_v30 = vld [vmem:[%s1418_s4 + $0x8] sm:$0xff]   ;;  %1025 = vmatprep.mubr.bf16.mxu1 %v1135_v29 }
   0xb   :  { %982 = vmatpush3.bf16.msra.mxu0 %v1110_v3  ;;  %v1128_v31 = vld [vmem:[%s1417_s5 + $0x20] sm:$0xff]   ;;  %v1119_v32 = vld [vmem:[%s1415_s0 + $0x18] sm:$0xff]   ;;  %v352_v33 = vld [vmem:[%s1416_s3 + $0x68] sm:$0xff] }
   0xc   :  { %983 = vmatprep.subr.bf16.mxu0 %v1111_v4  ;;  %402 = vperm.xlu1 %1107, %v348_v13   ;;  %v351_v34 = vld [vmem:[%s1416_s3 + $0x60] sm:$0xff]  ;;  %v1130_v36 = vld [vmem:[%s1417_s5 + $0x28] sm:$0xff]   ;;  %v354_v37 = vld [vmem:[%s1416_s3 + $0x78] sm:$0xff] }
   0xd   :  { %397 = vperm.xlu0 %1106, %v347_v14   ;;  %1012 = vmatpush3.bf16.msra.mxu1 %v1125_v16  ;;  %v1120_v35 = vld [vmem:[%s1415_s0 + $0x20] sm:$0xff]   ;;  %v353_v38 = vld [vmem:[%s1416_s3 + $0x70] sm:$0xff]  ;;  %v1136_v41 = vld [vmem:[%s1418_s4 + $0x18] sm:$0xff]  }
   0xe   :  { %1013 = vmatprep.subr.bf16.mxu1 %v1126_v20  ;;  %v1133_v39 = vld [vmem:[%s1418_s4 + $0x10] sm:$0xff]   ;;  %v1121_v42 = vld [vmem:[%s1415_s0 + $0x28] sm:$0xff]   ;;  %v1134_v44 = vld [vmem:[%s1417_s5 + $0x38] sm:$0xff]  }
   0xf   :  { %984 = vmatpush3.bf16.msra.mxu0 %v1111_v4  ;;  %v1132_v40 = vld [vmem:[%s1417_s5 + $0x30] sm:$0xff]   ;;  %v1138_v45 = vld [vmem:[%s1418_s4 + $0x20] sm:$0xff]   ;;  %v1137_v46 = vld [vmem:[%s1419_s2 + $0x8] sm:$0xff]  }
  0x10   :  { %985 = vmatprep.subr.bf16.mxu0 %v1112_v6  ;;  %412 = vperm.xlu1 %1107, %v350_v18   ;;  %v1122_v43 = vld [vmem:[%s1415_s0 + $0x30] sm:$0xff]   ;;  %v1140_v47 = vld [vmem:[%s1418_s4 + $0x28] sm:$0xff]   ;;  %v1123_v48 = vld [vmem:[%s1415_s0 + $0x38] sm:$0xff]  }
  0x11   :  { %407 = vperm.xlu0 %1106, %v349_v19   ;;  %1014 = vmatpush3.bf16.msra.mxu1 %v1126_v20  ;;  %v1139_v49 = vld [vmem:[%s1419_s2 + $0x10] sm:$0xff]   ;;  %v1141_v50 = vld [vmem:[%s1419_s2 + $0x18] sm:$0xff]   ;;  %v1144_v53 = vld [vmem:[%s1419_s2 + $0x20] sm:$0xff]  }
  0x12   :  { %1015 = vmatprep.subr.bf16.mxu1 %v1127_v26  ;;  %v1142_v51 = vld [vmem:[%s1418_s4 + $0x30] sm:$0xff]   ;;  %v1143_v52 = vld [vmem:[%s1418_s4 + $0x38] sm:$0xff]   ;;  %v1145_v54 = vld [vmem:[%s1419_s2 + $0x28] sm:$0xff]  }
  0x13   :  { %986 = vmatpush3.bf16.msra.mxu0 %v1112_v6  ;;  %v1146_v55 = vld [vmem:[%s1419_s2 + $0x30] sm:$0xff]   ;;  %v1147_v56 = vld [vmem:[%s1419_s2 + $0x38] sm:$0xff]  }
  0x14   :  { %987 = vmatprep.subr.bf16.mxu0 %v1113_v7  ;;  %382 = vperm.xlu1 %1107, %v344_v24  }
  0x15   :  { %377 = vperm.xlu0 %1106, %v343_v25   ;;  %1016 = vmatpush3.bf16.msra.mxu1 %v1127_v26 }
  0x16   :  { %1017 = vmatprep.subr.bf16.mxu1 %v1128_v31 }
  0x17   :  { %988 = vmatpush3.bf16.msra.mxu0 %v1113_v7 }
  0x18   :  { %989 = vmatprep.subr.bf16.mxu0 %v1114_v12  ;;  %392 = vperm.xlu1 %1107, %v346_v27  }
  0x19   :  { %387 = vperm.xlu0 %1106, %v345_v28   ;;  %1018 = vmatpush3.bf16.msra.mxu1 %v1128_v31 }
  0x1a   :  { %1019 = vmatprep.subr.bf16.mxu1 %v1130_v36 }
  0x1b   :  { %990 = vmatpush3.bf16.msra.mxu0 %v1114_v12 }
  0x1c   :  { %991 = vmatprep.subr.bf16.mxu0 %v1115_v17  ;;  %422 = vperm.xlu1 %1107, %v352_v33  }
  0x1d   :  { %417 = vperm.xlu0 %1106, %v351_v34   ;;  %1020 = vmatpush3.bf16.msra.mxu1 %v1130_v36 }
  0x1e   :  { %1021 = vmatprep.subr.bf16.mxu1 %v1132_v40 }
  0x1f   :  { %992 = vmatpush3.bf16.msra.mxu0 %v1115_v17 }
  0x20   :  { %1041 = vmatprep.subr.bf16.mxu0 %v1255_v22  ;;  %432 = vperm.xlu1 %1107, %v354_v37  }
  0x21   :  { %427 = vperm.xlu0 %1106, %v353_v38   ;;  %1022 = vmatpush3.bf16.msra.mxu1 %v1132_v40 }
  0x22   :  { %994 = vmatmul.mubr.bf16.vlgmr.msra.gmra.mrb[0].mxu0 %v1117_v21  ;;  %1023 = vmatprep.subr.bf16.mxu1 %v1134_v44 }
  0x23   :  { %997 = vmatprep.mubr.bf16.mxu0 %v1118_v23  ;;  %1042 = vmatpush3.bf16.msra.mxu0 %v1255_v22 }
  0x24   :  { %1043 = vmatprep.subr.bf16.mxu0 %v1131_v30 }
  0x25   :  { %1024 = vmatpush3.bf16.msra.mxu1 %v1134_v44 }
  0x26   :  { %1073 = vmatprep.subr.bf16.mxu1 %v1255_v22 }
  0x27   :  { %1044 = vmatpush3.bf16.msra.mxu0 %v1131_v30 }
  0x28   :  { %1045 = vmatprep.subr.bf16.mxu0 %v1133_v39  ;;  %1026 = vmatmul.mubr.bf16.vlgmr.msra.gmra.mrb[0].mxu1 %v1137_v46 }
  0x29   :  { %1081 = vmatpush3.bf16.msra.mxu1 %v1255_v22  ;;  %1029 = vmatprep.mubr.bf16.mxu1 %v1139_v49 }
  0x2a   :  { %998 = vmatmul.mubr.bf16.gmra.mrb[4].mxu0 %v1119_v32  ;;  %1074 = vmatprep.subr.bf16.mxu1 %v1131_v30 }
  0x2b   :  { %1001 = vmatprep.mubr.bf16.mxu0 %v1120_v35  ;;  %1046 = vmatpush3.bf16.msra.mxu0 %v1133_v39 }
  0x2c   :  { %1047 = vmatprep.subr.bf16.mxu0 %v1136_v41 }
  0x2d   :  { %1082 = vmatpush3.bf16.msra.mxu1 %v1131_v30 }
  0x2e   :  { %1075 = vmatprep.subr.bf16.mxu1 %v1133_v39 }
  0x2f   :  { %1048 = vmatpush3.bf16.msra.mxu0 %v1136_v41 }
  0x30   :  { %1049 = vmatprep.subr.bf16.mxu0 %v1138_v45  ;;  %1030 = vmatmul.mubr.bf16.gmra.mrb[4].mxu1 %v1141_v50 }
  0x31   :  { %1083 = vmatpush3.bf16.msra.mxu1 %v1133_v39  ;;  %1033 = vmatprep.mubr.bf16.mxu1 %v1144_v53 }
  0x32   :  { %1002 = vmatmul.mubr.bf16.gmra.mrb[8].mxu0 %v1121_v42  ;;  %1076 = vmatprep.subr.bf16.mxu1 %v1136_v41 }
  0x33   :  { %1005 = vmatprep.mubr.bf16.mxu0 %v1122_v43  ;;  %1050 = vmatpush3.bf16.msra.mxu0 %v1138_v45 }
  0x34   :  { %1051 = vmatprep.subr.bf16.mxu0 %v1140_v47 }
  0x35   :  { %1084 = vmatpush3.bf16.msra.mxu1 %v1136_v41 }
  0x36   :  { %1077 = vmatprep.subr.bf16.mxu1 %v1138_v45 }
  0x37   :  { %1052 = vmatpush3.bf16.msra.mxu0 %v1140_v47 }
  0x38   :  { %1053 = vmatprep.subr.bf16.mxu0 %v1142_v51  ;;  %1034 = vmatmul.mubr.bf16.gmra.mrb[8].mxu1 %v1145_v54 }
  0x39   :  { %1085 = vmatpush3.bf16.msra.mxu1 %v1138_v45  ;;  %1037 = vmatprep.mubr.bf16.mxu1 %v1146_v55 }
  0x3a   :  { %1006 = vmatmul.mubr.bf16.gmra.mrb[12].mxu0 %v1123_v48  ;;  %1078 = vmatprep.subr.bf16.mxu1 %v1140_v47 }
  0x3b   :  { %1054 = vmatpush3.bf16.msra.mxu0 %v1142_v51 }
  0x3c   :  { %1055 = vmatprep.subr.bf16.mxu0 %v1143_v52 }
  0x3d   :  { %1086 = vmatpush3.bf16.msra.mxu1 %v1140_v47 }
  0x3e   :  { %1079 = vmatprep.subr.bf16.mxu1 %v1142_v51 }
  0x3f   :  { %1056 = vmatpush3.bf16.msra.mxu0 %v1143_v52 }
  0x40   :  { %1038 = vmatmul.mubr.bf16.gmra.mrb[12].mxu1 %v1147_v56 }
  0x41   :  { %1087 = vmatpush3.bf16.msra.mxu1 %v1142_v51 }
  0x42   :  { %1080 = vmatprep.subr.bf16.mxu1 %v1143_v52 }
  0x45   :  { %1088 = vmatpush3.bf16.msra.mxu1 %v1143_v52 }
  0x83   :  { %v368_v57 = vpop.permute.xlu1 %367 }
  0x84   :  { %v358_v58 = vpop.permute.xlu0 %357 }
  0x87   :  { %v373_v59 = vpop.permute.xlu1 %372 }
  0x88   :  { %v363_v60 = vpop.permute.xlu0 %362 }
  0x8b   :  { %v403_v61 = vpop.permute.xlu1 %402 }
  0x8c   :  { %v398_v62 = vpop.permute.xlu0 %397 }
  0x8f   :  { %v413_v63 = vpop.permute.xlu1 %412 }
  0x90   :  { %v408_v0 = vpop.permute.xlu0 %407 }
  0x93   :  { %v383_v4 = vpop.permute.xlu1 %382 }
  0x94   :  { %v378_v8 = vpop.permute.xlu0 %377 }
  0x97   :  { %v393_v14 = vpop.permute.xlu1 %392 }
  0x98   :  { %v388_v16 = vpop.permute.xlu0 %387 }
  0x9b   :  { %v423_v25 = vpop.permute.xlu1 %422 }
  0x9c   :  { %v418_v27 = vpop.permute.xlu0 %417 }
  0x9f   :  { %v433_v36 = vpop.permute.xlu1 %432 }
  0xa0   :  { %v428_v38 = vpop.permute.xlu0 %427 }
  0xf5   :  { %v995_v1 = vpop.f32.mrb[0].mxu0 }
  0xf6   :  { %v225_v2 = vpop.f32.mrb[1].mxu0  ;;  %v437_v5 = vmul.f32 %v995_v1, %v368_v57 }
  0xf7   :  { %v996_v3 = vpop.f32.mrb[2].mxu0  ;;  %v435_v9 = vmul.f32 %v358_v58, %v225_v2  ;;  %v928_v58 = vld [vmem:[%s1420_s6] ss:$0 sm:$0xff] }
  0xf8   :  { %v438_v6 = vmul.f32 %v996_v3, %v373_v59  ;;  %v228_v7 = vpop.f32.mrb[3].mxu0 }
  0xf9   :  { %v436_v10 = vmul.f32 %v363_v60, %v228_v7 }
  0xfa   :  { %v452_v11 = vpack.c.bf16 %v438_v6, %v437_v5 }
  0xfb   :  { %v451_v12 = vpack.c.bf16 %v436_v10, %v435_v9  ;;  %v1027_v39 = vpop.f32.mrb[0].mxu1 }
  0xfc   :  { %v637_v41 = vpop.f32.mrb[1].mxu1 }
  0xfd   :  { %v999_v13 = vpop.f32.mrb[4].mxu0  ;;  %1057 = vmatprep.mubr.bf16.mxu0 %v451_v12  ;;  %v1028_v43 = vpop.f32.mrb[2].mxu1 }
  0xfe   :  { %v241_v15 = vpop.f32.mrb[5].mxu0  ;;  %1058 = vmatmul.mubr.bf16.vlgmr.msra.gmra.mrb[16].mxu0 %v452_v11  ;;  %v441_v18 = vmul.f32 %v999_v13, %v388_v16  ;;  %v640_v45 = vpop.f32.mrb[3].mxu1 }
  0xff   :  { %v1000_v17 = vpop.f32.mrb[6].mxu0  ;;  %v439_v21 = vmul.f32 %v378_v8, %v241_v15 }
 0x100   :  { %v442_v19 = vmul.f32 %v1000_v17, %v393_v14  ;;  %v244_v20 = vpop.f32.mrb[7].mxu0 }
 0x101   :  { %v440_v22 = vmul.f32 %v383_v4, %v244_v20 }
 0x102   :  { %v454_v23 = vpack.c.bf16 %v442_v19, %v441_v18 }
 0x103   :  { %v453_v24 = vpack.c.bf16 %v440_v22, %v439_v21  ;;  %v1031_v53 = vpop.f32.mrb[4].mxu1 }
 0x104   :  { %v653_v54 = vpop.f32.mrb[5].mxu1 }
 0x105   :  { %v1003_v26 = vpop.f32.mrb[8].mxu0  ;;  %1061 = vmatprep.mubr.bf16.mxu0 %v453_v24  ;;  %v1032_v55 = vpop.f32.mrb[6].mxu1 }
 0x106   :  { %v257_v28 = vpop.f32.mrb[9].mxu0  ;;  %1062 = vmatmul.mubr.bf16.gmra.mrb[20].mxu0 %v454_v23  ;;  %v445_v30 = vmul.f32 %v1003_v26, %v408_v0  ;;  %v656_v56 = vpop.f32.mrb[7].mxu1 }
 0x107   :  { %v1004_v29 = vpop.f32.mrb[10].mxu0  ;;  %v443_v33 = vmul.f32 %v398_v62, %v257_v28 }
 0x108   :  { %v446_v31 = vmul.f32 %v1004_v29, %v413_v63  ;;  %v260_v32 = vpop.f32.mrb[11].mxu0 }
 0x109   :  { %v444_v34 = vmul.f32 %v403_v61, %v260_v32 }
 0x10a   :  { %v456_v35 = vpack.c.bf16 %v446_v31, %v445_v30 }
 0x10b   :  { %v455_v37 = vpack.c.bf16 %v444_v34, %v443_v33 }
 0x10d   :  { %v1007_v40 = vpop.f32.mrb[12].mxu0  ;;  %1065 = vmatprep.mubr.bf16.mxu1 %v455_v37 }
 0x10e   :  { %v273_v42 = vpop.f32.mrb[13].mxu0  ;;  %1066 = vmatmul.mubr.bf16.vlgmr.msra.gmra.mrb[8].mxu1 %v456_v35  ;;  %v449_v46 = vmul.f32 %v1007_v40, %v428_v38 }
 0x10f   :  { %v1008_v44 = vpop.f32.mrb[14].mxu0  ;;  %v447_v49 = vmul.f32 %v418_v27, %v273_v42 }
 0x110   :  { %v450_v47 = vmul.f32 %v1008_v44, %v433_v36  ;;  %v276_v48 = vpop.f32.mrb[15].mxu0 }
 0x111   :  { %v448_v50 = vmul.f32 %v423_v25, %v276_v48 }
 0x112   :  { %v458_v51 = vpack.c.bf16 %v450_v47, %v449_v46 }
 0x113   :  { %v457_v52 = vpack.c.bf16 %v448_v50, %v447_v49 }
 0x115   :  { %1069 = vmatprep.mubr.bf16.mxu1 %v457_v52 }
 0x116   :  { %1070 = vmatmul.mubr.bf16.gmra.mrb[12].mxu1 %v458_v51 }
 0x1d1   :  { %v1059_v57 = vpop.f32.mrb[16].mxu0 }
 0x1d2   :  { %v791_v59 = vadd.f32 %v1059_v57, %v1027_v39  ;;  %v782_v60 = vpop.f32.mrb[17].mxu0 }
 0x1d3   :  { %v783_v61 = vadd.f32 %v782_v60, %v637_v41  ;;  %v1060_v62 = vpop.f32.mrb[18].mxu0 }
 0x1d4   :  { %v854_v63 = vadd.f32 %v928_v58, %v791_v59  ;;  %v794_v0 = vadd.f32 %v1060_v62, %v1028_v43  ;;  %v785_v1 = vpop.f32.mrb[19].mxu0 }
 0x1d5   :  { %v852_v2 = vadd.f32 %v928_v58, %v783_v61  ;;  %v786_v3 = vadd.f32 %v785_v1, %v640_v45 }
 0x1d6   :  { %870 = vst [vmem:[%s1421_s7 + $0x10] sm:$0xff] %v854_v63  ;;  %v855_v4 = vadd.f32 %v928_v58, %v794_v0 }
 0x1d7   :  { %868 = vst [vmem:[%s1421_s7] sm:$0xff] %v852_v2  ;;  %v853_v5 = vadd.f32 %v928_v58, %v786_v3 }
 0x1d8   :  { %871 = vst [vmem:[%s1421_s7 + $0x18] sm:$0xff] %v855_v4 }
 0x1d9   :  { %869 = vst [vmem:[%s1421_s7 + $0x8] sm:$0xff] %v853_v5  ;;  %v1063_v6 = vpop.f32.mrb[20].mxu0 }
 0x1da   :  { %v807_v7 = vadd.f32 %v1063_v6, %v1031_v53  ;;  %v798_v8 = vpop.f32.mrb[21].mxu0 }
 0x1db   :  { %v799_v9 = vadd.f32 %v798_v8, %v653_v54  ;;  %v1064_v10 = vpop.f32.mrb[22].mxu0 }
 0x1dc   :  { %v858_v11 = vadd.f32 %v928_v58, %v807_v7  ;;  %v810_v12 = vadd.f32 %v1064_v10, %v1032_v55  ;;  %v801_v13 = vpop.f32.mrb[23].mxu0 }
 0x1dd   :  { %v856_v14 = vadd.f32 %v928_v58, %v799_v9  ;;  %v802_v15 = vadd.f32 %v801_v13, %v656_v56 }
 0x1de   :  { %874 = vst [vmem:[%s1421_s7 + $0x30] sm:$0xff] %v858_v11  ;;  %v859_v16 = vadd.f32 %v928_v58, %v810_v12 }
 0x1df   :  { %872 = vst [vmem:[%s1421_s7 + $0x20] sm:$0xff] %v856_v14  ;;  %v857_v17 = vadd.f32 %v928_v58, %v802_v15 }
 0x1e0   :  { %875 = vst [vmem:[%s1421_s7 + $0x38] sm:$0xff] %v859_v16 }
 0x1e1   :  { %873 = vst [vmem:[%s1421_s7 + $0x28] sm:$0xff] %v857_v17  ;;  %v1067_v18 = vpop.f32.mrb[8].mxu1 }
 0x1e2   :  { %v862_v19 = vadd.f32 %v1067_v18, %v928_v58  ;;  %v814_v20 = vpop.f32.mrb[9].mxu1 }
 0x1e3   :  { %v860_v21 = vadd.f32 %v928_v58, %v814_v20  ;;  %v1068_v22 = vpop.f32.mrb[10].mxu1 }
 0x1e4   :  { %878 = vst [vmem:[%s1421_s7 + $0x50] sm:$0xff] %v862_v19  ;;  %v863_v23 = vadd.f32 %v1068_v22, %v928_v58  ;;  %v817_v24 = vpop.f32.mrb[11].mxu1 }
 0x1e5   :  { %876 = vst [vmem:[%s1421_s7 + $0x40] sm:$0xff] %v860_v21  ;;  %v861_v25 = vadd.f32 %v928_v58, %v817_v24 }
 0x1e6   :  { %879 = vst [vmem:[%s1421_s7 + $0x58] sm:$0xff] %v863_v23 }
 0x1e7   :  { %877 = vst [vmem:[%s1421_s7 + $0x48] sm:$0xff] %v861_v25 }
 0x1e9   :  { %v1071_v26 = vpop.f32.mrb[12].mxu1 }
 0x1ea   :  { %v866_v27 = vadd.f32 %v1071_v26, %v928_v58  ;;  %v830_v28 = vpop.f32.mrb[13].mxu1 }
 0x1eb   :  { %v864_v29 = vadd.f32 %v928_v58, %v830_v28  ;;  %v1072_v30 = vpop.f32.mrb[14].mxu1 }
 0x1ec   :  { %882 = vst [vmem:[%s1421_s7 + $0x70] sm:$0xff] %v866_v27  ;;  %v867_v31 = vadd.f32 %v1072_v30, %v928_v58  ;;  %v833_v32 = vpop.f32.mrb[15].mxu1 }
 0x1ed   :  { %880 = vst [vmem:[%s1421_s7 + $0x60] sm:$0xff] %v864_v29  ;;  %v865_v33 = vadd.f32 %v928_v58, %v833_v32 }
 0x1ee   :  { %883 = vst [vmem:[%s1421_s7 + $0x78] sm:$0xff] %v867_v31 }
 0x1ef   :  { %881 = vst [vmem:[%s1421_s7 + $0x68] sm:$0xff] %v865_v33 }

// kernel: node_encoder_forward.4
= control target key start
LH: loop header
LB: loop body
LE: loop exit
PB: predicated region body
PF: predicated region fallthrough
CT: control target
= control target key end

     0   :  { %v1223_v1 = vmov 0   ;;  %s1575_s1 = inlined_call_operand.vmem [shape: bf16[128,128], index: 1, kind: input, shape index: {}]   ;;  %s1576_s4 = inlined_call_operand.vmem [shape: bf16[256,128], index: 4, kind: input, shape index: {}]   ;;  %s1577_s0 = inlined_call_operand.vmem [shape: bf16[128,128], index: 0, kind: input, shape index: {}]   ;;  %s1578_s2 = inlined_call_operand.vmem [shape: bf16[128,256], index: 2, kind: input, shape index: {}]   ;;  %s1579_s3 = inlined_call_operand.vmem [shape: f32[128,1], index: 3, kind: input, shape index: {}]   ;;  %s1580_s5 = inlined_call_operand.vmem [shape: f32[1,128], index: 5, kind: input, shape index: {}]   ;;  %s1581_s6 = inlined_call_operand.vmem [shape: bf16[128,128], index: 6, kind: output, shape index: {}]  }
   0x1   :  { %v1167_v0 = vld [vmem:[%s1575_s1] sm:$0xff]   ;;  %1166 = vset.pattern.permute.xlu1 %v1223_v1  ;;  %1165 = vset.pattern.permute.xlu0 %v1223_v1  ;;  %v1170_v4 = vld [vmem:[%s1575_s1 + $0x8] sm:$0xff]   ;;  %v1173_v7 = vld [vmem:[%s1575_s1 + $0x10] sm:$0xff]  }
   0x2   :  { %v1168_v2 = vld [vmem:[%s1576_s4 + $0x40] sm:$0xff]   ;;  %1116 = vmatprep.subr.bf16.mxu0 %v1167_v0  ;;  %v1171_v5 = vld [vmem:[%s1576_s4 + $0x48] sm:$0xff]   ;;  %v1174_v8 = vld [vmem:[%s1576_s4 + $0x50] sm:$0xff]  }
   0x3   :  { %v1268_v3 = vld [vmem:[%s1576_s4] sm:$0xff]   ;;  %1148 = vmatprep.subr.bf16.mxu1 %v1168_v2  ;;  %1117 = vmatpush3.bf16.msra.mxu0 %v1167_v0  ;;  %v1280_v6 = vld [vmem:[%s1576_s4 + $0x8] sm:$0xff]   ;;  %v1292_v9 = vld [vmem:[%s1576_s4 + $0x10] sm:$0xff]  }
   0x4   :  { %1156 = vmatpush3.bf16.msra.mxu1 %v1268_v3  ;;  %1118 = vmatprep.subr.bf16.mxu0 %v1170_v4  ;;  %v1176_v10 = vld [vmem:[%s1575_s1 + $0x18] sm:$0xff]   ;;  %v1179_v13 = vld [vmem:[%s1575_s1 + $0x20] sm:$0xff]   ;;  %v1182_v16 = vld [vmem:[%s1575_s1 + $0x28] sm:$0xff]  }
   0x5   :  { %1149 = vmatprep.subr.bf16.mxu1 %v1171_v5  ;;  %v1300_v11 = vld [vmem:[%s1576_s4 + $0x58] sm:$0xff]   ;;  %v1315_v14 = vld [vmem:[%s1576_s4 + $0x60] sm:$0xff]   ;;  %v1330_v17 = vld [vmem:[%s1576_s4 + $0x68] sm:$0xff]  }
   0x6   :  { %v1305_v12 = vld [vmem:[%s1576_s4 + $0x18] sm:$0xff]   ;;  %v1320_v15 = vld [vmem:[%s1576_s4 + $0x20] sm:$0xff]   ;;  %v1335_v18 = vld [vmem:[%s1576_s4 + $0x28] sm:$0xff]  }
   0x7   :  { %1119 = vmatpush3.bf16.msra.mxu0 %v1170_v4  ;;  %v1185_v19 = vld [vmem:[%s1575_s1 + $0x30] sm:$0xff]   ;;  %v1188_v22 = vld [vmem:[%s1575_s1 + $0x38] sm:$0xff]   ;;  %v1191_v23 = vld [vmem:[%s1577_s0] sm:$0xff]  }
   0x8   :  { %1157 = vmatpush3.bf16.msra.mxu1 %v1280_v6  ;;  %1120 = vmatprep.subr.bf16.mxu0 %v1173_v7  ;;  %v1345_v20 = vld [vmem:[%s1576_s4 + $0x70] sm:$0xff]   ;;  %v1363_v24 = vld [vmem:[%s1576_s4 + $0x78] sm:$0xff]   ;;  %v1194_v25 = vld [vmem:[%s1578_s2 + $0x24] ss:$8 sps:$4 sm:$0xff]  }
   0x9   :  { %1150 = vmatprep.subr.bf16.mxu1 %v1174_v8  ;;  %v1350_v21 = vld [vmem:[%s1576_s4 + $0x30] sm:$0xff]   ;;  %1132 = vmatprep.mubr.bf16.mxu0 %v1191_v23  ;;  %v1372_v26 = vld [vmem:[%s1576_s4 + $0x38] sm:$0xff]   ;;  %v1195_v27 = vld [vmem:[%s1577_s0 + $0x8] sm:$0xff]  }
   0xa   :  { %720 = vmatprep.mubr.bf16.mxu1 %v1194_v25  ;;  %v1192_v28 = vld [vmem:[%s1578_s2 + $0x20] ss:$8 sps:$4 sm:$0xff]   ;;  %v1196_v29 = vld [vmem:[%s1577_s0 + $0x10] sm:$0xff]   ;;  %v1199_v31 = vld [vmem:[%s1577_s0 + $0x18] sm:$0xff]  }
   0xb   :  { %1121 = vmatpush3.bf16.msra.mxu0 %v1173_v7  ;;  %v1197_v30 = vld [vmem:[%s1578_s2 + $0x34] ss:$8 sps:$4 sm:$0xff]   ;;  %v1200_v32 = vld [vmem:[%s1578_s2 + $0x30] ss:$8 sps:$4 sm:$0xff]   ;;  %v1201_v33 = vld [vmem:[%s1577_s0 + $0x20] sm:$0xff]  }
   0xc   :  { %1158 = vmatpush3.bf16.msra.mxu1 %v1292_v9  ;;  %1122 = vmatprep.subr.bf16.mxu0 %v1176_v10  ;;  %v1202_v34 = vld [vmem:[%s1578_s2 + $0x44] ss:$8 sps:$4 sm:$0xff]   ;;  %v338_v35 = vld [vmem:[%s1579_s3 + $0x10] sm:$0xff]  ;;  %v339_v38 = vld [vmem:[%s1579_s3 + $0x18] sm:$0xff] }
   0xd   :  { %1151 = vmatprep.subr.bf16.mxu1 %v1300_v11  ;;  %v336_v36 = vld [vmem:[%s1579_s3] sm:$0xff]  ;;  %364 = vperm.xlu1 %1166, %v338_v35   ;;  %v1204_v37 = vld [vmem:[%s1577_s0 + $0x28] sm:$0xff]   ;;  %v1206_v41 = vld [vmem:[%s1577_s0 + $0x30] sm:$0xff]  }
   0xe   :  { %354 = vperm.xlu0 %1165, %v336_v36   ;;  %v1205_v39 = vld [vmem:[%s1578_s2 + $0x40] ss:$8 sps:$4 sm:$0xff]   ;;  %v1207_v42 = vld [vmem:[%s1578_s2 + $0x54] ss:$8 sps:$4 sm:$0xff]   ;;  %v1210_v47 = vld [vmem:[%s1578_s2 + $0x50] ss:$8 sps:$4 sm:$0xff]  }
   0xf   :  { %1123 = vmatpush3.bf16.msra.mxu0 %v1176_v10  ;;  %v337_v40 = vld [vmem:[%s1579_s3 + $0x8] sm:$0xff]  ;;  %v340_v44 = vld [vmem:[%s1579_s3 + $0x20] sm:$0xff]  ;;  %v1209_v45 = vld [vmem:[%s1577_s0 + $0x38] sm:$0xff]  }
  0x10   :  { %1159 = vmatpush3.bf16.msra.mxu1 %v1305_v12  ;;  %1124 = vmatprep.subr.bf16.mxu0 %v1179_v13  ;;  %v341_v43 = vld [vmem:[%s1579_s3 + $0x28] sm:$0xff]  ;;  %v343_v46 = vld [vmem:[%s1579_s3 + $0x38] sm:$0xff]  ;;  %v342_v48 = vld [vmem:[%s1579_s3 + $0x30] sm:$0xff] }
  0x11   :  { %1152 = vmatprep.subr.bf16.mxu1 %v1315_v14  ;;  %369 = vperm.xlu1 %1166, %v339_v38   ;;  %v1213_v49 = vld [vmem:[%s1578_s2 + $0x4] ss:$8 sps:$4 sm:$0xff]   ;;  %v1211_v53 = vld [vmem:[%s1578_s2] ss:$8 sps:$4 sm:$0xff]   ;;  %v347_v54 = vld [vmem:[%s1579_s3 + $0x58] sm:$0xff] }
  0x12   :  { %359 = vperm.xlu0 %1165, %v337_v40   ;;  %v1214_v50 = vld [vmem:[%s1578_s2 + $0x64] ss:$8 sps:$4 sm:$0xff]   ;;  %v1216_v55 = vld [vmem:[%s1578_s2 + $0x60] ss:$8 sps:$4 sm:$0xff]   ;;  %v1217_v56 = vld [vmem:[%s1578_s2 + $0x14] ss:$8 sps:$4 sm:$0xff]  }
  0x13   :  { %1125 = vmatpush3.bf16.msra.mxu0 %v1179_v13  ;;  %v345_v51 = vld [vmem:[%s1579_s3 + $0x48] sm:$0xff]  ;;  %v344_v52 = vld [vmem:[%s1579_s3 + $0x40] sm:$0xff]  ;;  %v346_v57 = vld [vmem:[%s1579_s3 + $0x50] sm:$0xff] }
  0x14   :  { %1160 = vmatpush3.bf16.msra.mxu1 %v1320_v15  ;;  %1126 = vmatprep.subr.bf16.mxu0 %v1182_v16  ;;  %v1219_v58 = vld [vmem:[%s1578_s2 + $0x74] ss:$8 sps:$4 sm:$0xff]   ;;  %v349_v59 = vld [vmem:[%s1579_s3 + $0x68] sm:$0xff]  ;;  %v348_v60 = vld [vmem:[%s1579_s3 + $0x60] sm:$0xff] }
  0x15   :  { %1153 = vmatprep.subr.bf16.mxu1 %v1330_v17  ;;  %379 = vperm.xlu1 %1166, %v341_v43   ;;  %v1221_v61 = vld [vmem:[%s1578_s2 + $0x10] ss:$8 sps:$4 sm:$0xff]  }
  0x16   :  { %374 = vperm.xlu0 %1165, %v340_v44   ;;  %v351_v62 = vld [vmem:[%s1579_s3 + $0x78] sm:$0xff]  ;;  %v350_v0 = vld [vmem:[%s1579_s3 + $0x70] sm:$0xff] }
  0x17   :  { %1127 = vmatpush3.bf16.msra.mxu0 %v1182_v16  ;;  %v1222_v63 = vld [vmem:[%s1578_s2 + $0x70] ss:$8 sps:$4 sm:$0xff]  }
  0x18   :  { %1161 = vmatpush3.bf16.msra.mxu1 %v1335_v18  ;;  %1128 = vmatprep.subr.bf16.mxu0 %v1185_v19 }
  0x19   :  { %1154 = vmatprep.subr.bf16.mxu1 %v1345_v20  ;;  %389 = vperm.xlu1 %1166, %v343_v46  }
  0x1a   :  { %384 = vperm.xlu0 %1165, %v342_v48  }
  0x1b   :  { %1129 = vmatpush3.bf16.msra.mxu0 %v1185_v19 }
  0x1c   :  { %1162 = vmatpush3.bf16.msra.mxu1 %v1350_v21  ;;  %1130 = vmatprep.subr.bf16.mxu0 %v1188_v22 }
  0x1d   :  { %1155 = vmatprep.subr.bf16.mxu1 %v1363_v24  ;;  %399 = vperm.xlu1 %1166, %v345_v51  }
  0x1e   :  { %394 = vperm.xlu0 %1165, %v344_v52  }
  0x1f   :  { %1131 = vmatpush3.bf16.msra.mxu0 %v1188_v22 }
  0x20   :  { %1163 = vmatpush3.bf16.msra.mxu1 %v1372_v26  ;;  %1052 = vmatprep.subr.bf16.mxu0 %v1168_v2 }
  0x21   :  { %409 = vperm.xlu1 %1166, %v347_v54  }
  0x22   :  { %1133 = vmatmul.mubr.bf16.vlgmr.msra.gmra.mrb[0].mxu0 %v1195_v27  ;;  %404 = vperm.xlu0 %1165, %v346_v57  }
  0x23   :  { %721 = vmatmul.mubr.bf16.vlgmr.msra.gmra.mrb[0].mxu1 %v1192_v28  ;;  %1053 = vmatpush3.bf16.msra.mxu0 %v1268_v3 }
  0x24   :  { %1054 = vmatprep.subr.bf16.mxu0 %v1171_v5  ;;  %1136 = vmatprep.mubr.bf16.mxu0 %v1196_v29 }
  0x25   :  { %728 = vmatprep.mubr.bf16.mxu1 %v1197_v30  ;;  %419 = vperm.xlu1 %1166, %v349_v59  }
  0x26   :  { %414 = vperm.xlu0 %1165, %v348_v60  }
  0x27   :  { %1055 = vmatpush3.bf16.msra.mxu0 %v1280_v6 }
  0x28   :  { %1056 = vmatprep.subr.bf16.mxu0 %v1174_v8 }
  0x29   :  { %429 = vperm.xlu1 %1166, %v351_v62  }
  0x2a   :  { %1137 = vmatmul.mubr.bf16.gmra.mrb[4].mxu0 %v1199_v31  ;;  %424 = vperm.xlu0 %1165, %v350_v0  }
  0x2b   :  { %729 = vmatmul.mubr.bf16.gmra.mrb[4].mxu1 %v1200_v32  ;;  %1057 = vmatpush3.bf16.msra.mxu0 %v1292_v9 }
  0x2c   :  { %1058 = vmatprep.subr.bf16.mxu0 %v1300_v11  ;;  %1140 = vmatprep.mubr.bf16.mxu0 %v1201_v33 }
  0x2d   :  { %736 = vmatprep.mubr.bf16.mxu1 %v1202_v34 }
  0x2f   :  { %1059 = vmatpush3.bf16.msra.mxu0 %v1305_v12 }
  0x30   :  { %1060 = vmatprep.subr.bf16.mxu0 %v1315_v14 }
  0x32   :  { %1141 = vmatmul.mubr.bf16.gmra.mrb[8].mxu0 %v1204_v37 }
  0x33   :  { %737 = vmatmul.mubr.bf16.gmra.mrb[8].mxu1 %v1205_v39  ;;  %1061 = vmatpush3.bf16.msra.mxu0 %v1320_v15 }
  0x34   :  { %1062 = vmatprep.subr.bf16.mxu0 %v1330_v17  ;;  %1144 = vmatprep.mubr.bf16.mxu0 %v1206_v41 }
  0x35   :  { %744 = vmatprep.mubr.bf16.mxu1 %v1207_v42 }
  0x37   :  { %1063 = vmatpush3.bf16.msra.mxu0 %v1335_v18 }
  0x38   :  { %1064 = vmatprep.subr.bf16.mxu0 %v1345_v20 }
  0x3a   :  { %1145 = vmatmul.mubr.bf16.gmra.mrb[12].mxu0 %v1209_v45 }
  0x3b   :  { %745 = vmatmul.mubr.bf16.gmra.mrb[12].mxu1 %v1210_v47  ;;  %1065 = vmatpush3.bf16.msra.mxu0 %v1350_v21 }
  0x3c   :  { %1066 = vmatprep.subr.bf16.mxu0 %v1363_v24  ;;  %704 = vmatprep.mubr.bf16.mxu0 %v1213_v49 }
  0x3d   :  { %752 = vmatprep.mubr.bf16.mxu1 %v1214_v50 }
  0x3f   :  { %1067 = vmatpush3.bf16.msra.mxu0 %v1372_v26  ;;  %v1522_v26 = vld [vmem:[%s1580_s5] ss:$0 sm:$0xff] }
  0x42   :  { %705 = vmatmul.mubr.bf16.vlgmr.msra.gmra.mrb[16].mxu0 %v1211_v53 }
  0x43   :  { %753 = vmatmul.mubr.bf16.gmra.mrb[16].mxu1 %v1216_v55  ;;  %712 = vmatprep.mubr.bf16.mxu0 %v1217_v56 }
  0x44   :  { %760 = vmatprep.mubr.bf16.mxu1 %v1219_v58 }
  0x4a   :  { %713 = vmatmul.mubr.bf16.gmra.mrb[20].mxu0 %v1221_v61 }
  0x4b   :  { %761 = vmatmul.mubr.bf16.gmra.mrb[20].mxu1 %v1222_v63 }
  0x8c   :  { %v1503_v1 = vpop.permute.xlu1 %364 }
  0x8d   :  { %v1505_v2 = vpop.permute.xlu0 %354 }
  0x90   :  { %v1507_v3 = vpop.permute.xlu1 %369 }
  0x91   :  { %v1509_v4 = vpop.permute.xlu0 %359 }
  0x94   :  { %v380_v5 = vpop.permute.xlu1 %379 }
  0x95   :  { %v375_v6 = vpop.permute.xlu0 %374 }
  0x98   :  { %v390_v17 = vpop.permute.xlu1 %389 }
  0x99   :  { %v385_v18 = vpop.permute.xlu0 %384 }
  0x9c   :  { %v400_v38 = vpop.permute.xlu1 %399 }
  0x9d   :  { %v395_v41 = vpop.permute.xlu0 %394 }
  0xf5   :  { %v1511_v7 = vpop.f32.mrb[0].mxu0 }
  0xf6   :  { %v1080_v8 = vpop.f32.mrb[0].mxu1  ;;  %v1513_v9 = vpop.f32.mrb[1].mxu0 }
  0xf7   :  { %v1081_v10 = vpop.f32.mrb[1].mxu1  ;;  %v1515_v11 = vpop.f32.mrb[2].mxu0 }
  0xf8   :  { %v1082_v12 = vadd.f32 %v1081_v10, %v1080_v8  ;;  %v1083_v13 = vpop.f32.mrb[2].mxu1  ;;  %v1517_v14 = vpop.f32.mrb[3].mxu0 }
  0xf9   :  { %v1084_v15 = vpop.f32.mrb[3].mxu1 }
  0xfa   :  { %v1085_v16 = vadd.f32 %v1084_v15, %v1083_v13 }
  0xfd   :  { %v1138_v19 = vpop.f32.mrb[4].mxu0 }
  0xfe   :  { %v438_v20 = vmul.f32 %v1138_v19, %v385_v18  ;;  %v1086_v21 = vpop.f32.mrb[4].mxu1  ;;  %v238_v22 = vpop.f32.mrb[5].mxu0 }
  0xff   :  { %v436_v23 = vmul.f32 %v375_v6, %v238_v22  ;;  %v1087_v24 = vpop.f32.mrb[5].mxu1  ;;  %v1139_v25 = vpop.f32.mrb[6].mxu0 }
 0x100   :  { %v1088_v27 = vadd.f32 %v1087_v24, %v1086_v21  ;;  %v439_v28 = vmul.f32 %v1139_v25, %v390_v17  ;;  %v1089_v29 = vpop.f32.mrb[6].mxu1  ;;  %v241_v30 = vpop.f32.mrb[7].mxu0 }
 0x101   :  { %v773_v31 = vadd.f32 %v1082_v12, %v436_v23  ;;  %v437_v32 = vmul.f32 %v380_v5, %v241_v30  ;;  %v1090_v33 = vpop.f32.mrb[7].mxu1  ;;  %v405_v5 = vpop.permute.xlu0 %404 }
 0x102   :  { %v775_v34 = vadd.f32 %v1088_v27, %v438_v20  ;;  %v1091_v35 = vadd.f32 %v1090_v33, %v1089_v29  ;;  %v410_v22 = vpop.permute.xlu1 %409 }
 0x103   :  { %v796_v36 = vadd.f32 %v1522_v26, %v773_v31  ;;  %v774_v37 = vadd.f32 %v1085_v16, %v437_v32 }
 0x104   :  { %v798_v39 = vadd.f32 %v1522_v26, %v775_v34  ;;  %v776_v40 = vadd.f32 %v1091_v35, %v439_v28 }
 0x105   :  { %v797_v42 = vadd.f32 %v1522_v26, %v774_v37  ;;  %v1142_v43 = vpop.f32.mrb[8].mxu0  ;;  %v812_v47 = vmax.f32 %v796_v36, 0.0  ;;  %v415_v31 = vpop.permute.xlu0 %414  ;;  %v432_v36 = vmul.f32 %v1505_v2, %v1513_v9 }
 0x106   :  { %v799_v44 = vadd.f32 %v1522_v26, %v776_v40  ;;  %v1092_v45 = vpop.f32.mrb[8].mxu1  ;;  %v254_v46 = vpop.f32.mrb[9].mxu0  ;;  %v814_v52 = vmax.f32 %v798_v39, 0.0  ;;  %v442_v16 = vmul.f32 %v1142_v43, %v405_v5 }
 0x107   :  { %v813_v48 = vmax.f32 %v797_v42, 0.0  ;;  %v440_v49 = vmul.f32 %v395_v41, %v254_v46  ;;  %v1093_v50 = vpop.f32.mrb[9].mxu1  ;;  %v1143_v51 = vpop.f32.mrb[10].mxu0  ;;  %v433_v46 = vmul.f32 %v1509_v4, %v1517_v14 }
 0x108   :  { %v815_v53 = vmax.f32 %v799_v44, 0.0  ;;  %v1094_v54 = vadd.f32 %v1093_v50, %v1092_v45  ;;  %v1095_v55 = vpop.f32.mrb[10].mxu1  ;;  %v257_v56 = vpop.f32.mrb[11].mxu0  ;;  %v443_v24 = vmul.f32 %v1143_v51, %v410_v22 }
 0x109   :  { %v1002_v57 = vpack.c.bf16 %v813_v48, %v812_v47  ;;  %v441_v58 = vmul.f32 %v400_v38, %v257_v56  ;;  %v1096_v59 = vpop.f32.mrb[11].mxu1  ;;  %v420_v47 = vpop.permute.xlu1 %419 }
 0x10a   :  { %v1007_v60 = vpack.c.bf16 %v815_v53, %v814_v52  ;;  %v777_v61 = vadd.f32 %v1094_v54, %v440_v49  ;;  %v1097_v62 = vadd.f32 %v1096_v59, %v1095_v55 }
 0x10b   :  { %1030 = vst [vmem:[%s1581_s6 + $0x10] sm:$0xff] %v1002_v57   ;;  %v425_v57 = vpop.permute.xlu0 %424 }
 0x10c   :  { %1031 = vst [vmem:[%s1581_s6 + $0x18] sm:$0xff] %v1007_v60   ;;  %v800_v63 = vadd.f32 %v1522_v26, %v777_v61  ;;  %v778_v0 = vadd.f32 %v1097_v62, %v441_v58  ;;  %v434_v61 = vmul.f32 %v1511_v7, %v1503_v1 }
 0x10d   :  { %v1146_v6 = vpop.f32.mrb[12].mxu0 }
 0x10e   :  { %v801_v8 = vadd.f32 %v1522_v26, %v778_v0  ;;  %v1098_v10 = vpop.f32.mrb[12].mxu1  ;;  %v270_v12 = vpop.f32.mrb[13].mxu0  ;;  %v816_v17 = vmax.f32 %v800_v63, 0.0 }
 0x10f   :  { %v1099_v13 = vpop.f32.mrb[13].mxu1  ;;  %v1536_v15 = vpop.f32.mrb[14].mxu0  ;;  %v444_v40 = vmul.f32 %v415_v31, %v270_v12 }
 0x110   :  { %v817_v18 = vmax.f32 %v801_v8, 0.0  ;;  %v1100_v19 = vadd.f32 %v1099_v13, %v1098_v10  ;;  %v1101_v20 = vpop.f32.mrb[14].mxu1  ;;  %v273_v21 = vpop.f32.mrb[15].mxu0  ;;  %v446_v10 = vmul.f32 %v1146_v6, %v425_v57 }
 0x111   :  { %v1102_v23 = vpop.f32.mrb[15].mxu1  ;;  %v445_v51 = vmul.f32 %v420_v47, %v273_v21 }
 0x112   :  { %v1012_v25 = vpack.c.bf16 %v817_v18, %v816_v17  ;;  %v779_v27 = vadd.f32 %v1100_v19, %v442_v16  ;;  %v1103_v28 = vadd.f32 %v1102_v23, %v1101_v20  ;;  %v435_v19 = vmul.f32 %v1515_v11, %v1507_v3  ;;  %v430_v20 = vpop.permute.xlu1 %429 }
 0x113   :  { %v447_v1 = vmul.f32 %v1536_v15, %v430_v20 }
 0x114   :  { %1032 = vst [vmem:[%s1581_s6 + $0x20] sm:$0xff] %v1012_v25   ;;  %v802_v29 = vadd.f32 %v1522_v26, %v779_v27  ;;  %v780_v30 = vadd.f32 %v1103_v28, %v443_v24 }
 0x115   :  { %v1068_v32 = vpop.f32.mrb[16].mxu0 }
 0x116   :  { %v803_v33 = vadd.f32 %v1522_v26, %v780_v30  ;;  %v1104_v34 = vpop.f32.mrb[16].mxu1  ;;  %v1069_v35 = vpop.f32.mrb[17].mxu0  ;;  %v818_v41 = vmax.f32 %v802_v29, 0.0 }
 0x117   :  { %v1070_v37 = vadd.f32 %v1069_v35, %v1068_v32  ;;  %v1105_v38 = vpop.f32.mrb[17].mxu1  ;;  %v1071_v39 = vpop.f32.mrb[18].mxu0 }
 0x118   :  { %v819_v42 = vmax.f32 %v803_v33, 0.0  ;;  %v1106_v43 = vadd.f32 %v1105_v38, %v1104_v34  ;;  %v1107_v44 = vpop.f32.mrb[18].mxu1  ;;  %v1072_v45 = vpop.f32.mrb[19].mxu0 }
 0x119   :  { %v769_v48 = vadd.f32 %v1070_v37, %v432_v36  ;;  %v1073_v49 = vadd.f32 %v1072_v45, %v1071_v39  ;;  %v1108_v50 = vpop.f32.mrb[19].mxu1 }
 0x11a   :  { %v1017_v52 = vpack.c.bf16 %v819_v42, %v818_v41  ;;  %v781_v53 = vadd.f32 %v1106_v43, %v444_v40  ;;  %v1109_v2 = vadd.f32 %v1108_v50, %v1107_v44 }
 0x11b   :  { %v792_v9 = vadd.f32 %v1522_v26, %v769_v48  ;;  %v770_v54 = vadd.f32 %v1073_v49, %v433_v46 }
 0x11c   :  { %1033 = vst [vmem:[%s1581_s6 + $0x28] sm:$0xff] %v1017_v52   ;;  %v804_v55 = vadd.f32 %v1522_v26, %v781_v53  ;;  %v782_v56 = vadd.f32 %v1109_v2, %v445_v51 }
 0x11d   :  { %v793_v4 = vadd.f32 %v1522_v26, %v770_v54  ;;  %v1074_v14 = vpop.f32.mrb[20].mxu0  ;;  %v808_v62 = vmax.f32 %v792_v9, 0.0 }
 0x11e   :  { %v805_v58 = vadd.f32 %v1522_v26, %v782_v56  ;;  %v1110_v59 = vpop.f32.mrb[20].mxu1  ;;  %v1075_v60 = vpop.f32.mrb[21].mxu0  ;;  %v820_v12 = vmax.f32 %v804_v55, 0.0 }
 0x11f   :  { %v809_v63 = vmax.f32 %v793_v4, 0.0  ;;  %v1076_v0 = vadd.f32 %v1075_v60, %v1074_v14  ;;  %v1111_v5 = vpop.f32.mrb[21].mxu1  ;;  %v1077_v8 = vpop.f32.mrb[22].mxu0 }
 0x120   :  { %v821_v13 = vmax.f32 %v805_v58, 0.0  ;;  %v1112_v16 = vadd.f32 %v1111_v5, %v1110_v59  ;;  %v1113_v17 = vpop.f32.mrb[22].mxu1  ;;  %v1078_v18 = vpop.f32.mrb[23].mxu0 }
 0x121   :  { %v992_v21 = vpack.c.bf16 %v809_v63, %v808_v62  ;;  %v771_v22 = vadd.f32 %v1076_v0, %v434_v61  ;;  %v1079_v23 = vadd.f32 %v1078_v18, %v1077_v8  ;;  %v1114_v24 = vpop.f32.mrb[23].mxu1 }
 0x122   :  { %v1022_v7 = vpack.c.bf16 %v821_v13, %v820_v12  ;;  %v783_v25 = vadd.f32 %v1112_v16, %v446_v10  ;;  %v1115_v27 = vadd.f32 %v1114_v24, %v1113_v17 }
 0x123   :  { %993 = vst [vmem:[%s1581_s6] sm:$0xff] %v992_v21   ;;  %v794_v6 = vadd.f32 %v1522_v26, %v771_v22  ;;  %v772_v28 = vadd.f32 %v1079_v23, %v435_v19 }
 0x124   :  { %1034 = vst [vmem:[%s1581_s6 + $0x30] sm:$0xff] %v1022_v7   ;;  %v806_v3 = vadd.f32 %v1522_v26, %v783_v25  ;;  %v784_v11 = vadd.f32 %v1115_v27, %v447_v1 }
 0x125   :  { %v795_v29 = vadd.f32 %v1522_v26, %v772_v28  ;;  %v810_v30 = vmax.f32 %v794_v6, 0.0 }
 0x126   :  { %v807_v15 = vadd.f32 %v1522_v26, %v784_v11  ;;  %v822_v32 = vmax.f32 %v806_v3, 0.0 }
 0x127   :  { %v811_v31 = vmax.f32 %v795_v29, 0.0 }
 0x128   :  { %v823_v33 = vmax.f32 %v807_v15, 0.0 }
 0x129   :  { %v997_v34 = vpack.c.bf16 %v811_v31, %v810_v30 }
 0x12a   :  { %v1027_v35 = vpack.c.bf16 %v823_v33, %v822_v32 }
 0x12b   :  { %1029 = vst [vmem:[%s1581_s6 + $0x8] sm:$0xff] %v997_v34  }
 0x12c   :  { %1035 = vst [vmem:[%s1581_s6 + $0x38] sm:$0xff] %v1027_v35  }

// kernel: node_encoder_forward.3
= control target key start
LH: loop header
LB: loop body
LE: loop exit
PB: predicated region body
PF: predicated region fallthrough
CT: control target
= control target key end

     0   :  { %v1392_v1 = vmov 0   ;;  %s1806_s1 = inlined_call_operand.vmem [shape: bf16[128,128], index: 1, kind: input, shape index: {}, may-alias: {1,2}]   ;;  %s1807_s0 = inlined_call_operand.vmem [shape: bf16[128,128], index: 0, kind: input, shape index: {}]   ;;  %s1808_s3 = inlined_call_operand.vmem [shape: f32[128,1], index: 3, kind: input, shape index: {}]   ;;  %s1809_s5 = inlined_call_operand.vmem [shape: bf16[128,256], index: 5, kind: input, shape index: {}]   ;;  %s1810_s4 = inlined_call_operand.vmem [shape: bf16[128,256], index: 4, kind: input, shape index: {}]   ;;  %s1811_s2 = inlined_call_operand.vmem [shape: bf16[128,128], index: 2, kind: input, shape index: {}, may-alias: {1,2}]   ;;  %s1812_s6 = inlined_call_operand.vmem [shape: f32[1,256], index: 6, kind: input, shape index: {}]   ;;  %s1813_s7 = inlined_call_operand.vmem [shape: bf16[128,256], index: 7, kind: output, shape index: {}]  }
   0x1   :  { %v1320_v0 = vld [vmem:[%s1806_s1] sm:$0xff]   ;;  %1318 = vset.pattern.permute.xlu0 %v1392_v1  ;;  %1319 = vset.pattern.permute.xlu1 %v1392_v1  ;;  %v1321_v2 = vld [vmem:[%s1806_s1 + $0x8] sm:$0xff]   ;;  %v1322_v3 = vld [vmem:[%s1806_s1 + $0x10] sm:$0xff]  }
   0x2   :  { %667 = vmatprep.mubr.bf16.mxu1 %v1392_v1  ;;  %1237 = vmatprep.subr.bf16.mxu0 %v1320_v0  ;;  %v1323_v4 = vld [vmem:[%s1806_s1 + $0x18] sm:$0xff]   ;;  %v1328_v5 = vld [vmem:[%s1807_s0] sm:$0xff]   ;;  %v1325_v7 = vld [vmem:[%s1806_s1 + $0x28] sm:$0xff]  }
   0x3   :  { %1238 = vmatpush3.bf16.msra.mxu0 %v1320_v0  ;;  %1253 = vmatprep.mubr.bf16.mxu0 %v1328_v5  ;;  %v1324_v6 = vld [vmem:[%s1806_s1 + $0x20] sm:$0xff]   ;;  %v341_v9 = vld [vmem:[%s1808_s3 + $0x10] sm:$0xff]  ;;  %v340_v10 = vld [vmem:[%s1808_s3 + $0x8] sm:$0xff] }
   0x4   :  { %1239 = vmatprep.subr.bf16.mxu0 %v1321_v2  ;;  %v339_v8 = vld [vmem:[%s1808_s3] sm:$0xff]  ;;  %367 = vperm.xlu1 %1319, %v341_v9   ;;  %v342_v11 = vld [vmem:[%s1808_s3 + $0x18] sm:$0xff]  ;;  %v1326_v12 = vld [vmem:[%s1806_s1 + $0x30] sm:$0xff]  }
   0x5   :  { %357 = vperm.xlu0 %1318, %v339_v8   ;;  %v343_v13 = vld [vmem:[%s1808_s3 + $0x20] sm:$0xff]  ;;  %v344_v14 = vld [vmem:[%s1808_s3 + $0x28] sm:$0xff]  ;;  %v1339_v17 = vld [vmem:[%s1809_s5 + $0x14] ss:$8 sps:$4 sm:$0xff]  }
   0x6   :  { %v1336_v15 = vld [vmem:[%s1809_s5 + $0x4] ss:$8 sps:$4 sm:$0xff]   ;;  %v1338_v16 = vld [vmem:[%s1809_s5] ss:$8 sps:$4 sm:$0xff]   ;;  %v1327_v18 = vld [vmem:[%s1806_s1 + $0x38] sm:$0xff]  }
   0x7   :  { %1240 = vmatpush3.bf16.msra.mxu0 %v1321_v2  ;;  %635 = vmatprep.subr.bf16.mxu1 %v1336_v15  ;;  %v345_v19 = vld [vmem:[%s1808_s3 + $0x30] sm:$0xff]  ;;  %v346_v20 = vld [vmem:[%s1808_s3 + $0x38] sm:$0xff]  ;;  %v1342_v22 = vld [vmem:[%s1809_s5 + $0x24] ss:$8 sps:$4 sm:$0xff]  }
   0x8   :  { %1241 = vmatprep.subr.bf16.mxu0 %v1322_v3  ;;  %372 = vperm.xlu1 %1319, %v342_v11   ;;  %v1341_v21 = vld [vmem:[%s1809_s5 + $0x10] ss:$8 sps:$4 sm:$0xff]   ;;  %v1329_v23 = vld [vmem:[%s1807_s0 + $0x8] sm:$0xff]   ;;  %v347_v24 = vld [vmem:[%s1808_s3 + $0x40] sm:$0xff] }
   0x9   :  { %362 = vperm.xlu0 %1318, %v340_v10   ;;  %636 = vmatpush1.bf16.msra.mxu1 %v1338_v16  ;;  %v348_v25 = vld [vmem:[%s1808_s3 + $0x48] sm:$0xff]  ;;  %v1330_v27 = vld [vmem:[%s1807_s0 + $0x10] sm:$0xff]   ;;  %v351_v29 = vld [vmem:[%s1808_s3 + $0x60] sm:$0xff] }
   0xa   :  { %637 = vmatprep.subr.bf16.mxu1 %v1339_v17  ;;  %v1344_v26 = vld [vmem:[%s1809_s5 + $0x20] ss:$8 sps:$4 sm:$0xff]   ;;  %v1345_v28 = vld [vmem:[%s1809_s5 + $0x34] ss:$8 sps:$4 sm:$0xff]   ;;  %v1347_v31 = vld [vmem:[%s1809_s5 + $0x30] ss:$8 sps:$4 sm:$0xff]  }
   0xb   :  { %1242 = vmatpush3.bf16.msra.mxu0 %v1322_v3  ;;  %v352_v30 = vld [vmem:[%s1808_s3 + $0x68] sm:$0xff]  ;;  %v1331_v35 = vld [vmem:[%s1807_s0 + $0x18] sm:$0xff]   ;;  %v1332_v37 = vld [vmem:[%s1807_s0 + $0x20] sm:$0xff]  }
   0xc   :  { %1243 = vmatprep.subr.bf16.mxu0 %v1323_v4  ;;  %382 = vperm.xlu1 %1319, %v344_v14   ;;  %v1532_v32 = vld [vmem:[%s1810_s4] ss:$8 sps:$4 sm:$0xff]   ;;  %v1363_v33 = vld [vmem:[%s1810_s4 + $0x4] ss:$8 sps:$4 sm:$0xff]   ;;  %v1367_v36 = vld [vmem:[%s1810_s4 + $0x14] ss:$8 sps:$4 sm:$0xff]  }
   0xd   :  { %377 = vperm.xlu0 %1318, %v343_v13   ;;  %638 = vmatpush1.bf16.msra.mxu1 %v1341_v21  ;;  %v1348_v34 = vld [vmem:[%s1809_s5 + $0x44] ss:$8 sps:$4 sm:$0xff]   ;;  %v349_v38 = vld [vmem:[%s1808_s3 + $0x50] sm:$0xff]  ;;  %v350_v39 = vld [vmem:[%s1808_s3 + $0x58] sm:$0xff] }
   0xe   :  { %639 = vmatprep.subr.bf16.mxu1 %v1342_v22  ;;  %v1350_v40 = vld [vmem:[%s1809_s5 + $0x40] ss:$8 sps:$4 sm:$0xff]   ;;  %v1351_v41 = vld [vmem:[%s1809_s5 + $0x54] ss:$8 sps:$4 sm:$0xff]   ;;  %v1365_v43 = vld [vmem:[%s1810_s4 + $0x10] ss:$8 sps:$4 sm:$0xff]  }
   0xf   :  { %1244 = vmatpush3.bf16.msra.mxu0 %v1323_v4  ;;  %v353_v42 = vld [vmem:[%s1808_s3 + $0x70] sm:$0xff]  ;;  %v354_v44 = vld [vmem:[%s1808_s3 + $0x78] sm:$0xff]  ;;  %v1370_v46 = vld [vmem:[%s1810_s4 + $0x24] ss:$8 sps:$4 sm:$0xff]  }
  0x10   :  { %1245 = vmatprep.subr.bf16.mxu0 %v1324_v6  ;;  %392 = vperm.xlu1 %1319, %v346_v20   ;;  %v1353_v45 = vld [vmem:[%s1809_s5 + $0x50] ss:$8 sps:$4 sm:$0xff]   ;;  %v1354_v47 = vld [vmem:[%s1809_s5 + $0x64] ss:$8 sps:$4 sm:$0xff]   ;;  %v1356_v49 = vld [vmem:[%s1809_s5 + $0x60] ss:$8 sps:$4 sm:$0xff]  }
  0x11   :  { %387 = vperm.xlu0 %1318, %v345_v19   ;;  %640 = vmatpush1.bf16.msra.mxu1 %v1344_v26  ;;  %v1333_v48 = vld [vmem:[%s1807_s0 + $0x28] sm:$0xff]   ;;  %v1334_v51 = vld [vmem:[%s1807_s0 + $0x30] sm:$0xff]   ;;  %v1360_v58 = vld [vmem:[%s1811_s2] sm:$0xff]  }
  0x12   :  { %641 = vmatprep.subr.bf16.mxu1 %v1345_v28  ;;  %v1368_v50 = vld [vmem:[%s1810_s4 + $0x20] ss:$8 sps:$4 sm:$0xff]   ;;  %v1357_v52 = vld [vmem:[%s1809_s5 + $0x74] ss:$8 sps:$4 sm:$0xff]   ;;  %v1372_v54 = vld [vmem:[%s1810_s4 + $0x30] ss:$8 sps:$4 sm:$0xff]  }
  0x13   :  { %1246 = vmatpush3.bf16.msra.mxu0 %v1324_v6  ;;  %v1374_v53 = vld [vmem:[%s1810_s4 + $0x34] ss:$8 sps:$4 sm:$0xff]   ;;  %v1377_v55 = vld [vmem:[%s1810_s4 + $0x44] ss:$8 sps:$4 sm:$0xff]   ;;  %v1359_v56 = vld [vmem:[%s1809_s5 + $0x70] ss:$8 sps:$4 sm:$0xff]  }
  0x14   :  { %1247 = vmatprep.subr.bf16.mxu0 %v1325_v7  ;;  %402 = vperm.xlu1 %1319, %v348_v25   ;;  %v1375_v57 = vld [vmem:[%s1810_s4 + $0x40] ss:$8 sps:$4 sm:$0xff]   ;;  %v1381_v59 = vld [vmem:[%s1810_s4 + $0x54] ss:$8 sps:$4 sm:$0xff]   ;;  %v1379_v61 = vld [vmem:[%s1810_s4 + $0x50] ss:$8 sps:$4 sm:$0xff]  }
  0x15   :  { %397 = vperm.xlu0 %1318, %v347_v24   ;;  %642 = vmatpush1.bf16.msra.mxu1 %v1347_v31  ;;  %v1335_v60 = vld [vmem:[%s1807_s0 + $0x38] sm:$0xff]   ;;  %v1384_v62 = vld [vmem:[%s1810_s4 + $0x64] ss:$8 sps:$4 sm:$0xff]   ;;  %v1382_v63 = vld [vmem:[%s1810_s4 + $0x60] ss:$8 sps:$4 sm:$0xff]  }
  0x16   :  { %643 = vmatprep.subr.bf16.mxu1 %v1348_v34  ;;  %v1364_v0 = vld [vmem:[%s1811_s2 + $0x8] sm:$0xff]   ;;  %v1371_v2 = vld [vmem:[%s1811_s2 + $0x10] sm:$0xff]   ;;  %v1378_v3 = vld [vmem:[%s1811_s2 + $0x18] sm:$0xff]  }
  0x17   :  { %1248 = vmatpush3.bf16.msra.mxu0 %v1325_v7  ;;  %v1385_v4 = vld [vmem:[%s1811_s2 + $0x20] sm:$0xff]   ;;  %v1388_v5 = vld [vmem:[%s1810_s4 + $0x74] ss:$8 sps:$4 sm:$0xff]   ;;  %v1386_v6 = vld [vmem:[%s1810_s4 + $0x70] ss:$8 sps:$4 sm:$0xff]  }
  0x18   :  { %1249 = vmatprep.subr.bf16.mxu0 %v1326_v12  ;;  %422 = vperm.xlu1 %1319, %v352_v30   ;;  %v1389_v7 = vld [vmem:[%s1811_s2 + $0x28] sm:$0xff]   ;;  %v1390_v8 = vld [vmem:[%s1811_s2 + $0x30] sm:$0xff]   ;;  %v1391_v9 = vld [vmem:[%s1811_s2 + $0x38] sm:$0xff]  }
  0x19   :  { %417 = vperm.xlu0 %1318, %v351_v29   ;;  %644 = vmatpush1.bf16.msra.mxu1 %v1350_v40 }
  0x1a   :  { %645 = vmatprep.subr.bf16.mxu1 %v1351_v41 }
  0x1b   :  { %1250 = vmatpush3.bf16.msra.mxu0 %v1326_v12 }
  0x1c   :  { %1251 = vmatprep.subr.bf16.mxu0 %v1327_v18  ;;  %412 = vperm.xlu1 %1319, %v350_v39  }
  0x1d   :  { %407 = vperm.xlu0 %1318, %v349_v38   ;;  %646 = vmatpush1.bf16.msra.mxu1 %v1353_v45 }
  0x1e   :  { %647 = vmatprep.subr.bf16.mxu1 %v1354_v47 }
  0x1f   :  { %1252 = vmatpush3.bf16.msra.mxu0 %v1327_v18 }
  0x20   :  { %828 = vmatprep.subr.bf16.mxu0 %v1363_v33  ;;  %432 = vperm.xlu1 %1319, %v354_v44  }
  0x21   :  { %427 = vperm.xlu0 %1318, %v353_v42   ;;  %648 = vmatpush1.bf16.msra.mxu1 %v1356_v49 }
  0x22   :  { %1254 = vmatmul.mubr.bf16.vlgmr.msra.gmra.mrb[0].mxu0 %v1329_v23  ;;  %649 = vmatprep.subr.bf16.mxu1 %v1357_v52 }
  0x23   :  { %1257 = vmatprep.mubr.bf16.mxu0 %v1330_v27  ;;  %829 = vmatpush1.bf16.msra.mxu0 %v1532_v32 }
  0x24   :  { %830 = vmatprep.subr.bf16.mxu0 %v1367_v36 }
  0x25   :  { %650 = vmatpush1.bf16.msra.mxu1 %v1359_v56 }
  0x26   :  { %1269 = vmatprep.subr.bf16.mxu1 %v1363_v33 }
  0x27   :  { %831 = vmatpush1.bf16.msra.mxu0 %v1365_v43 }
  0x28   :  { %832 = vmatprep.subr.bf16.mxu0 %v1370_v46  ;;  %668 = vmatmul.mubr.bf16.vlgmr.msra.gmra.mrb[0].mxu1 %v1360_v58 }
  0x29   :  { %677 = vmatprep.mubr.bf16.mxu1 %v1392_v1  ;;  %1277 = vmatpush1.bf16.msra.mxu1 %v1532_v32 }
  0x2a   :  { %1258 = vmatmul.mubr.bf16.gmra.mrb[4].mxu0 %v1331_v35  ;;  %1270 = vmatprep.subr.bf16.mxu1 %v1367_v36 }
  0x2b   :  { %1261 = vmatprep.mubr.bf16.mxu0 %v1332_v37  ;;  %833 = vmatpush1.bf16.msra.mxu0 %v1368_v50 }
  0x2c   :  { %834 = vmatprep.subr.bf16.mxu0 %v1374_v53 }
  0x2d   :  { %1278 = vmatpush1.bf16.msra.mxu1 %v1365_v43 }
  0x2e   :  { %1271 = vmatprep.subr.bf16.mxu1 %v1370_v46 }
  0x2f   :  { %835 = vmatpush1.bf16.msra.mxu0 %v1372_v54 }
  0x30   :  { %836 = vmatprep.subr.bf16.mxu0 %v1377_v55  ;;  %678 = vmatmul.mubr.bf16.gmra.mrb[4].mxu1 %v1364_v0 }
  0x31   :  { %687 = vmatprep.mubr.bf16.mxu1 %v1392_v1  ;;  %1279 = vmatpush1.bf16.msra.mxu1 %v1368_v50 }
  0x32   :  { %1262 = vmatmul.mubr.bf16.gmra.mrb[8].mxu0 %v1333_v48  ;;  %1272 = vmatprep.subr.bf16.mxu1 %v1374_v53 }
  0x33   :  { %1265 = vmatprep.mubr.bf16.mxu0 %v1334_v51  ;;  %837 = vmatpush1.bf16.msra.mxu0 %v1375_v57 }
  0x34   :  { %838 = vmatprep.subr.bf16.mxu0 %v1381_v59 }
  0x35   :  { %1280 = vmatpush1.bf16.msra.mxu1 %v1372_v54 }
  0x36   :  { %1273 = vmatprep.subr.bf16.mxu1 %v1377_v55 }
  0x37   :  { %839 = vmatpush1.bf16.msra.mxu0 %v1379_v61 }
  0x38   :  { %840 = vmatprep.subr.bf16.mxu0 %v1384_v62  ;;  %688 = vmatmul.mubr.bf16.gmra.mrb[8].mxu1 %v1371_v2 }
  0x39   :  { %697 = vmatprep.mubr.bf16.mxu1 %v1392_v1  ;;  %1281 = vmatpush1.bf16.msra.mxu1 %v1375_v57 }
  0x3a   :  { %1266 = vmatmul.mubr.bf16.gmra.mrb[12].mxu0 %v1335_v60  ;;  %1274 = vmatprep.subr.bf16.mxu1 %v1381_v59 }
  0x3b   :  { %860 = vmatprep.mubr.bf16.mxu0 %v1392_v1  ;;  %841 = vmatpush1.bf16.msra.mxu0 %v1382_v63 }
  0x3c   :  { %842 = vmatprep.subr.bf16.mxu0 %v1388_v5 }
  0x3d   :  { %1282 = vmatpush1.bf16.msra.mxu1 %v1379_v61 }
  0x3e   :  { %1275 = vmatprep.subr.bf16.mxu1 %v1384_v62 }
  0x3f   :  { %843 = vmatpush1.bf16.msra.mxu0 %v1386_v6 }
  0x40   :  { %698 = vmatmul.mubr.bf16.gmra.mrb[12].mxu1 %v1378_v3 }
  0x41   :  { %707 = vmatprep.mubr.bf16.mxu1 %v1392_v1  ;;  %1283 = vmatpush1.bf16.msra.mxu1 %v1382_v63 }
  0x42   :  { %1276 = vmatprep.subr.bf16.mxu1 %v1388_v5 }
  0x45   :  { %1284 = vmatpush1.bf16.msra.mxu1 %v1386_v6 }
  0x48   :  { %708 = vmatmul.mubr.bf16.gmra.mrb[16].mxu1 %v1385_v4 }
  0x49   :  { %717 = vmatprep.mubr.bf16.mxu1 %v1392_v1 }
  0x50   :  { %718 = vmatmul.mubr.bf16.gmra.mrb[20].mxu1 %v1389_v7 }
  0x51   :  { %727 = vmatprep.mubr.bf16.mxu1 %v1392_v1 }
  0x58   :  { %728 = vmatmul.mubr.bf16.gmra.mrb[24].mxu1 %v1390_v8 }
  0x59   :  { %737 = vmatprep.mubr.bf16.mxu1 %v1392_v1 }
  0x60   :  { %738 = vmatmul.mubr.bf16.gmra.mrb[28].mxu1 %v1391_v9 }
  0x61   :  { %920 = vmatprep.mubr.bf16.mxu1 %v1392_v1 }
  0x83   :  { %v368_v11 = vpop.permute.xlu1 %367 }
  0x84   :  { %v358_v10 = vpop.permute.xlu0 %357 }
  0x87   :  { %v373_v13 = vpop.permute.xlu1 %372 }
  0x88   :  { %v363_v12 = vpop.permute.xlu0 %362 }
  0x8b   :  { %v383_v15 = vpop.permute.xlu1 %382 }
  0x8c   :  { %v378_v14 = vpop.permute.xlu0 %377 }
  0x8f   :  { %v393_v17 = vpop.permute.xlu1 %392 }
  0x90   :  { %v388_v16 = vpop.permute.xlu0 %387 }
  0x93   :  { %v403_v27 = vpop.permute.xlu1 %402 }
  0x94   :  { %v398_v24 = vpop.permute.xlu0 %397 }
  0x97   :  { %v423_v34 = vpop.permute.xlu1 %422 }
  0x98   :  { %v418_v32 = vpop.permute.xlu0 %417 }
  0x9b   :  { %v413_v44 = vpop.permute.xlu1 %412 }
  0x9c   :  { %v408_v42 = vpop.permute.xlu0 %407 }
  0x9f   :  { %v433_v55 = vpop.permute.xlu1 %432 }
  0xa0   :  { %v428_v53 = vpop.permute.xlu0 %427 }
  0xf5   :  { %v1255_v18 = vpop.f32.mrb[0].mxu0 }
  0xf6   :  { %v225_v19 = vpop.f32.mrb[1].mxu0  ;;  %v437_v21 = vmul.f32 %v1255_v18, %v368_v11 }
  0xf7   :  { %v1256_v20 = vpop.f32.mrb[2].mxu0  ;;  %v435_v25 = vmul.f32 %v358_v10, %v225_v19 }
  0xf8   :  { %v438_v22 = vmul.f32 %v1256_v20, %v373_v13  ;;  %v228_v23 = vpop.f32.mrb[3].mxu0 }
  0xf9   :  { %v436_v26 = vmul.f32 %v363_v12, %v228_v23 }
  0xfa   :  { %v452_v28 = vpack.c.bf16 %v438_v22, %v437_v21 }
  0xfb   :  { %v451_v29 = vpack.c.bf16 %v436_v26, %v435_v25  ;;  %v669_v56 = vpop.f32.mrb[0].mxu1  ;;  %v943_v26 = vlaneseq }
  0xfc   :  { %v671_v58 = vpop.f32.mrb[1].mxu1 }
  0xfd   :  { %v1259_v30 = vpop.f32.mrb[4].mxu0  ;;  %861 = vmatmul.mubr.bf16.vlgmr.msra.gmra.mrb[16].mxu0 %v451_v29  ;;  %v673_v60 = vpop.f32.mrb[2].mxu1  ;;  %v941_v29 = vld [vmem:[%s1812_s6] sm:$0x3] }
  0xfe   :  { %v241_v31 = vpop.f32.mrb[5].mxu0  ;;  %870 = vmatprep.mubr.bf16.mxu0 %v1392_v1  ;;  %v441_v35 = vmul.f32 %v1259_v30, %v388_v16  ;;  %v675_v62 = vpop.f32.mrb[3].mxu1 }
  0xff   :  { %v1260_v33 = vpop.f32.mrb[6].mxu0  ;;  %v439_v38 = vmul.f32 %v378_v14, %v241_v31 }
 0x100   :  { %v442_v36 = vmul.f32 %v1260_v33, %v393_v17  ;;  %v244_v37 = vpop.f32.mrb[7].mxu0 }
 0x101   :  { %v440_v39 = vmul.f32 %v383_v15, %v244_v37 }
 0x102   :  { %v454_v40 = vpack.c.bf16 %v442_v36, %v441_v35 }
 0x103   :  { %v453_v41 = vpack.c.bf16 %v440_v39, %v439_v38  ;;  %v679_v7 = vpop.f32.mrb[4].mxu1 }
 0x104   :  { %v681_v8 = vpop.f32.mrb[5].mxu1 }
 0x105   :  { %v1263_v43 = vpop.f32.mrb[8].mxu0  ;;  %871 = vmatmul.mubr.bf16.gmra.mrb[20].mxu0 %v452_v28  ;;  %v683_v9 = vpop.f32.mrb[6].mxu1 }
 0x106   :  { %v257_v45 = vpop.f32.mrb[9].mxu0  ;;  %880 = vmatprep.mubr.bf16.mxu0 %v1392_v1  ;;  %v445_v47 = vmul.f32 %v1263_v43, %v408_v42  ;;  %v685_v10 = vpop.f32.mrb[7].mxu1 }
 0x107   :  { %v1264_v46 = vpop.f32.mrb[10].mxu0  ;;  %v443_v50 = vmul.f32 %v398_v24, %v257_v45 }
 0x108   :  { %v446_v48 = vmul.f32 %v1264_v46, %v413_v44  ;;  %v260_v49 = vpop.f32.mrb[11].mxu0 }
 0x109   :  { %v444_v51 = vmul.f32 %v403_v27, %v260_v49  ;;  %v944_v27 = vshrl.u32 %v943_v26, 7 }
 0x10a   :  { %v456_v52 = vpack.c.bf16 %v446_v48, %v445_v47 }
 0x10b   :  { %v455_v54 = vpack.c.bf16 %v444_v51, %v443_v50  ;;  %v1670_v11 = vpop.f32.mrb[8].mxu1  ;;  %v945_v28 = vsub.s32 0, %v944_v27  ;;  %v949_v30 = vsub.s32 1, %v944_v27 }
 0x10c   :  { %v1672_v12 = vpop.f32.mrb[9].mxu1 }
 0x10d   :  { %v1267_v57 = vpop.f32.mrb[12].mxu0  ;;  %881 = vmatmul.mubr.bf16.gmra.mrb[24].mxu0 %v453_v41  ;;  %v1675_v13 = vpop.f32.mrb[10].mxu1  ;;  %v1706_v31 = vrot.slane %v941_v29, %v945_v28  ;;  %v1708_v33 = vrot.slane %v941_v29, %v949_v30 }
 0x10e   :  { %v273_v59 = vpop.f32.mrb[13].mxu0  ;;  %890 = vmatprep.mubr.bf16.mxu0 %v1392_v1  ;;  %v449_v63 = vmul.f32 %v1267_v57, %v428_v53  ;;  %v1677_v14 = vpop.f32.mrb[11].mxu1 }
 0x10f   :  { %v1268_v61 = vpop.f32.mrb[14].mxu0  ;;  %v447_v3 = vmul.f32 %v418_v32, %v273_v59 }
 0x110   :  { %v450_v0 = vmul.f32 %v1268_v61, %v433_v55  ;;  %v276_v2 = vpop.f32.mrb[15].mxu0 }
 0x111   :  { %v448_v4 = vmul.f32 %v423_v34, %v276_v2 }
 0x112   :  { %v458_v5 = vpack.c.bf16 %v450_v0, %v449_v63 }
 0x113   :  { %v457_v6 = vpack.c.bf16 %v448_v4, %v447_v3  ;;  %v1679_v15 = vpop.f32.mrb[12].mxu1 }
 0x114   :  { %v1681_v16 = vpop.f32.mrb[13].mxu1 }
 0x115   :  { %891 = vmatmul.mubr.bf16.gmra.mrb[28].mxu0 %v454_v40  ;;  %921 = vmatmul.mubr.bf16.vlgmr.msra.gmra.mrb[24].mxu1 %v457_v6  ;;  %v1683_v17 = vpop.f32.mrb[14].mxu1 }
 0x116   :  { %900 = vmatprep.mubr.bf16.mxu0 %v1392_v1  ;;  %930 = vmatprep.mubr.bf16.mxu1 %v1392_v1  ;;  %v1685_v18 = vpop.f32.mrb[15].mxu1 }
 0x11b   :  { %v1687_v19 = vpop.f32.mrb[16].mxu1 }
 0x11c   :  { %v1689_v20 = vpop.f32.mrb[17].mxu1 }
 0x11d   :  { %901 = vmatmul.mubr.bf16.gmra.mrb[32].mxu0 %v455_v54  ;;  %931 = vmatmul.mubr.bf16.gmra.mrb[28].mxu1 %v458_v5  ;;  %v1691_v21 = vpop.f32.mrb[18].mxu1 }
 0x11e   :  { %910 = vmatprep.mubr.bf16.mxu0 %v1392_v1  ;;  %v1693_v1 = vpop.f32.mrb[19].mxu1 }
 0x123   :  { %v1695_v22 = vpop.f32.mrb[20].mxu1 }
 0x124   :  { %v1697_v23 = vpop.f32.mrb[21].mxu1 }
 0x125   :  { %911 = vmatmul.mubr.bf16.gmra.mrb[36].mxu0 %v456_v52  ;;  %v1699_v24 = vpop.f32.mrb[22].mxu1 }
 0x126   :  { %v1701_v25 = vpop.f32.mrb[23].mxu1 }
 0x1d0   :  { %v862_v32 = vpop.f32.mrb[16].mxu0 }
 0x1d1   :  { %v863_v34 = vadd.f32 %v862_v32, %v669_v56  ;;  %v864_v35 = vpop.f32.mrb[17].mxu0 }
 0x1d2   :  { %v865_v36 = vadd.f32 %v864_v35, %v671_v58  ;;  %v866_v37 = vpop.f32.mrb[18].mxu0 }
 0x1d3   :  { %v953_v38 = vadd.f32 %v1706_v31, %v863_v34  ;;  %v867_v39 = vadd.f32 %v866_v37, %v673_v60  ;;  %v868_v40 = vpop.f32.mrb[19].mxu0 }
 0x1d4   :  { %v954_v41 = vadd.f32 %v1708_v33, %v865_v36  ;;  %v869_v42 = vadd.f32 %v868_v40, %v675_v62 }
 0x1d5   :  { %v985_v43 = vmax.f32 %v953_v38, 0.0  ;;  %v955_v44 = vadd.f32 %v1706_v31, %v867_v39 }
 0x1d6   :  { %v986_v45 = vmax.f32 %v954_v41, 0.0  ;;  %v956_v46 = vadd.f32 %v1708_v33, %v869_v42 }
 0x1d7   :  { %v987_v47 = vmax.f32 %v955_v44, 0.0 }
 0x1d8   :  { %v1205_v48 = vpack.c.bf16 %v986_v45, %v985_v43  ;;  %v988_v49 = vmax.f32 %v956_v46, 0.0  ;;  %v872_v50 = vpop.f32.mrb[20].mxu0 }
 0x1d9   :  { %v873_v51 = vadd.f32 %v872_v50, %v679_v7  ;;  %v874_v52 = vpop.f32.mrb[21].mxu0 }
 0x1da   :  { %1113 = vst [vmem:[%s1813_s7] sm:$0xff] %v1205_v48  ;;  %v1206_v53 = vpack.c.bf16 %v988_v49, %v987_v47  ;;  %v875_v54 = vadd.f32 %v874_v52, %v681_v8  ;;  %v876_v55 = vpop.f32.mrb[22].mxu0 }
 0x1db   :  { %v957_v56 = vadd.f32 %v1706_v31, %v873_v51  ;;  %v877_v57 = vadd.f32 %v876_v55, %v683_v9  ;;  %v878_v58 = vpop.f32.mrb[23].mxu0 }
 0x1dc   :  { %1114 = vst [vmem:[%s1813_s7 + $0x8] sm:$0xff] %v1206_v53  ;;  %v958_v59 = vadd.f32 %v1708_v33, %v875_v54  ;;  %v879_v60 = vadd.f32 %v878_v58, %v685_v10 }
 0x1dd   :  { %v989_v61 = vmax.f32 %v957_v56, 0.0  ;;  %v959_v62 = vadd.f32 %v1706_v31, %v877_v57 }
 0x1de   :  { %v990_v63 = vmax.f32 %v958_v59, 0.0  ;;  %v960_v0 = vadd.f32 %v1708_v33, %v879_v60 }
 0x1df   :  { %v991_v2 = vmax.f32 %v959_v62, 0.0 }
 0x1e0   :  { %v1207_v3 = vpack.c.bf16 %v990_v63, %v989_v61  ;;  %v992_v4 = vmax.f32 %v960_v0, 0.0  ;;  %v882_v5 = vpop.f32.mrb[24].mxu0 }
 0x1e1   :  { %v883_v6 = vadd.f32 %v882_v5, %v1670_v11  ;;  %v884_v7 = vpop.f32.mrb[25].mxu0 }
 0x1e2   :  { %1115 = vst [vmem:[%s1813_s7 + $0x10] sm:$0xff] %v1207_v3  ;;  %v1208_v8 = vpack.c.bf16 %v992_v4, %v991_v2  ;;  %v885_v9 = vadd.f32 %v884_v7, %v1672_v12  ;;  %v886_v10 = vpop.f32.mrb[26].mxu0 }
 0x1e3   :  { %v961_v26 = vadd.f32 %v1706_v31, %v883_v6  ;;  %v887_v27 = vadd.f32 %v886_v10, %v1675_v13  ;;  %v888_v28 = vpop.f32.mrb[27].mxu0 }
 0x1e4   :  { %1116 = vst [vmem:[%s1813_s7 + $0x18] sm:$0xff] %v1208_v8  ;;  %v962_v11 = vadd.f32 %v1708_v33, %v885_v9  ;;  %v889_v29 = vadd.f32 %v888_v28, %v1677_v14 }
 0x1e5   :  { %v993_v30 = vmax.f32 %v961_v26, 0.0  ;;  %v963_v32 = vadd.f32 %v1706_v31, %v887_v27 }
 0x1e6   :  { %v994_v34 = vmax.f32 %v962_v11, 0.0  ;;  %v964_v12 = vadd.f32 %v1708_v33, %v889_v29 }
 0x1e7   :  { %v995_v35 = vmax.f32 %v963_v32, 0.0 }
 0x1e8   :  { %v1209_v36 = vpack.c.bf16 %v994_v34, %v993_v30  ;;  %v996_v37 = vmax.f32 %v964_v12, 0.0  ;;  %v892_v38 = vpop.f32.mrb[28].mxu0  ;;  %v922_v13 = vpop.f32.mrb[24].mxu1 }
 0x1e9   :  { %v893_v39 = vadd.f32 %v892_v38, %v1679_v15  ;;  %v977_v40 = vadd.f32 %v1706_v31, %v922_v13  ;;  %v894_v41 = vpop.f32.mrb[29].mxu0  ;;  %v924_v42 = vpop.f32.mrb[25].mxu1 }
 0x1ea   :  { %1117 = vst [vmem:[%s1813_s7 + $0x20] sm:$0xff] %v1209_v36  ;;  %v1210_v14 = vpack.c.bf16 %v996_v37, %v995_v35  ;;  %v895_v43 = vadd.f32 %v894_v41, %v1681_v16  ;;  %v978_v44 = vadd.f32 %v1708_v33, %v924_v42  ;;  %v896_v45 = vpop.f32.mrb[30].mxu0  ;;  %v926_v46 = vpop.f32.mrb[26].mxu1 }
 0x1eb   :  { %v965_v47 = vadd.f32 %v1706_v31, %v893_v39  ;;  %v1009_v48 = vmax.f32 %v977_v40, 0.0  ;;  %v897_v15 = vadd.f32 %v896_v45, %v1683_v17  ;;  %v979_v49 = vadd.f32 %v1706_v31, %v926_v46  ;;  %v898_v50 = vpop.f32.mrb[31].mxu0  ;;  %v928_v51 = vpop.f32.mrb[27].mxu1 }
 0x1ec   :  { %1118 = vst [vmem:[%s1813_s7 + $0x28] sm:$0xff] %v1210_v14  ;;  %v966_v52 = vadd.f32 %v1708_v33, %v895_v43  ;;  %v1010_v16 = vmax.f32 %v978_v44, 0.0  ;;  %v899_v53 = vadd.f32 %v898_v50, %v1685_v18  ;;  %v980_v54 = vadd.f32 %v1708_v33, %v928_v51 }
 0x1ed   :  { %v997_v55 = vmax.f32 %v965_v47, 0.0  ;;  %v967_v56 = vadd.f32 %v1706_v31, %v897_v15  ;;  %v1011_v57 = vmax.f32 %v979_v49, 0.0 }
 0x1ee   :  { %v998_v17 = vmax.f32 %v966_v52, 0.0  ;;  %v1217_v58 = vpack.c.bf16 %v1010_v16, %v1009_v48  ;;  %v968_v59 = vadd.f32 %v1708_v33, %v899_v53  ;;  %v1012_v60 = vmax.f32 %v980_v54, 0.0 }
 0x1ef   :  { %v999_v61 = vmax.f32 %v967_v56, 0.0 }
 0x1f0   :  { %v1211_v62 = vpack.c.bf16 %v998_v17, %v997_v55  ;;  %1125 = vst [vmem:[%s1813_s7 + $0x60] sm:$0xff] %v1217_v58  ;;  %v1000_v63 = vmax.f32 %v968_v59, 0.0  ;;  %v1218_v0 = vpack.c.bf16 %v1012_v60, %v1011_v57  ;;  %v902_v18 = vpop.f32.mrb[32].mxu0  ;;  %v932_v2 = vpop.f32.mrb[28].mxu1 }
 0x1f1   :  { %v903_v3 = vadd.f32 %v902_v18, %v1687_v19  ;;  %v981_v4 = vadd.f32 %v1706_v31, %v932_v2  ;;  %v904_v5 = vpop.f32.mrb[33].mxu0  ;;  %v934_v6 = vpop.f32.mrb[29].mxu1 }
 0x1f2   :  { %1119 = vst [vmem:[%s1813_s7 + $0x30] sm:$0xff] %v1211_v62  ;;  %v1212_v7 = vpack.c.bf16 %v1000_v63, %v999_v61  ;;  %1126 = vst [vmem:[%s1813_s7 + $0x68] sm:$0xff] %v1218_v0  ;;  %v905_v8 = vadd.f32 %v904_v5, %v1689_v20  ;;  %v982_v9 = vadd.f32 %v1708_v33, %v934_v6  ;;  %v906_v10 = vpop.f32.mrb[34].mxu0  ;;  %v936_v26 = vpop.f32.mrb[30].mxu1 }
 0x1f3   :  { %v969_v19 = vadd.f32 %v1706_v31, %v903_v3  ;;  %v1013_v27 = vmax.f32 %v981_v4, 0.0  ;;  %v907_v28 = vadd.f32 %v906_v10, %v1691_v21  ;;  %v983_v11 = vadd.f32 %v1706_v31, %v936_v26  ;;  %v908_v29 = vpop.f32.mrb[35].mxu0  ;;  %v938_v30 = vpop.f32.mrb[31].mxu1 }
 0x1f4   :  { %1120 = vst [vmem:[%s1813_s7 + $0x38] sm:$0xff] %v1212_v7  ;;  %v970_v32 = vadd.f32 %v1708_v33, %v905_v8  ;;  %v1014_v20 = vmax.f32 %v982_v9, 0.0  ;;  %v909_v34 = vadd.f32 %v908_v29, %v1693_v1  ;;  %v984_v12 = vadd.f32 %v1708_v33, %v938_v30 }
 0x1f5   :  { %v1001_v35 = vmax.f32 %v969_v19, 0.0  ;;  %v971_v36 = vadd.f32 %v1706_v31, %v907_v28  ;;  %v1015_v37 = vmax.f32 %v983_v11, 0.0 }
 0x1f6   :  { %v1002_v21 = vmax.f32 %v970_v32, 0.0  ;;  %v1219_v38 = vpack.c.bf16 %v1014_v20, %v1013_v27  ;;  %v972_v13 = vadd.f32 %v1708_v33, %v909_v34  ;;  %v1016_v39 = vmax.f32 %v984_v12, 0.0 }
 0x1f7   :  { %v1003_v40 = vmax.f32 %v971_v36, 0.0 }
 0x1f8   :  { %v1213_v41 = vpack.c.bf16 %v1002_v21, %v1001_v35  ;;  %1127 = vst [vmem:[%s1813_s7 + $0x70] sm:$0xff] %v1219_v38  ;;  %v1004_v42 = vmax.f32 %v972_v13, 0.0  ;;  %v1220_v14 = vpack.c.bf16 %v1016_v39, %v1015_v37  ;;  %v912_v1 = vpop.f32.mrb[36].mxu0 }
 0x1f9   :  { %v913_v43 = vadd.f32 %v912_v1, %v1695_v22  ;;  %v914_v44 = vpop.f32.mrb[37].mxu0 }
 0x1fa   :  { %1121 = vst [vmem:[%s1813_s7 + $0x40] sm:$0xff] %v1213_v41  ;;  %v1214_v45 = vpack.c.bf16 %v1004_v42, %v1003_v40  ;;  %1128 = vst [vmem:[%s1813_s7 + $0x78] sm:$0xff] %v1220_v14  ;;  %v915_v46 = vadd.f32 %v914_v44, %v1697_v23  ;;  %v916_v47 = vpop.f32.mrb[38].mxu0 }
 0x1fb   :  { %v973_v48 = vadd.f32 %v1706_v31, %v913_v43  ;;  %v917_v15 = vadd.f32 %v916_v47, %v1699_v24  ;;  %v918_v49 = vpop.f32.mrb[39].mxu0 }
 0x1fc   :  { %1122 = vst [vmem:[%s1813_s7 + $0x48] sm:$0xff] %v1214_v45  ;;  %v974_v22 = vadd.f32 %v1708_v33, %v915_v46  ;;  %v919_v50 = vadd.f32 %v918_v49, %v1701_v25 }
 0x1fd   :  { %v1005_v51 = vmax.f32 %v973_v48, 0.0  ;;  %v975_v52 = vadd.f32 %v1706_v31, %v917_v15 }
 0x1fe   :  { %v1006_v16 = vmax.f32 %v974_v22, 0.0  ;;  %v976_v23 = vadd.f32 %v1708_v33, %v919_v50 }
 0x1ff   :  { %v1007_v53 = vmax.f32 %v975_v52, 0.0 }
 0x200   :  { %v1215_v54 = vpack.c.bf16 %v1006_v16, %v1005_v51  ;;  %v1008_v55 = vmax.f32 %v976_v23, 0.0 }
 0x202   :  { %1123 = vst [vmem:[%s1813_s7 + $0x50] sm:$0xff] %v1215_v54  ;;  %v1216_v24 = vpack.c.bf16 %v1008_v55, %v1007_v53 }
 0x204   :  { %1124 = vst [vmem:[%s1813_s7 + $0x58] sm:$0xff] %v1216_v24 }

</bundles_post_ra>
